<compile_context>
chip_gen: v7x
topology: tpu7x:2x2x1
jax: 0.10.0
libtpu: 0.0.40
codegen_flags: <defaults>
</compile_context>

<pallas_src>
import jax
import jax.numpy as jnp
import numpy as np
from jax import lax
from jax.experimental import pallas as pl
from jax.experimental.pallas import tpu as pltpu


def _make_kernel(n_blk, H, W, Cin, Chp):
    H2, W2 = H // 2, W // 2
    H4, W4 = H2 // 2, W2 // 2
    K1 = 9 * Cin
    M2 = n_blk * H2 * W2          # conv2 rows (= pooled conv1 pixels per block)
    M1 = 4 * M2                   # conv1 rows (pool-window-major: 4 window positions)

    def kernel(p1_ref, w1_ref, b1_ref, w2_ref, b2_ref, wl_ref, bl_ref,
               out_ref, pad_ref):
        Nb = n_blk

        # ---- conv block 1: one im2col matmul (patches built in wrapper), bias + ReLU ----
        p1 = p1_ref[...].reshape(M1, K1)                      # free merge (sublane dim % 8 == 0)
        h1 = jnp.dot(p1, w1_ref[...], preferred_element_type=jnp.float32)   # (M1, Chp)
        h1 = jnp.maximum(h1 + b1_ref[...], 0.0)

        # ---- maxpool1: rows are (window-pos, n, y2, x2) -> pool = 3 wide element-wise maxes ----
        h1 = h1.reshape(4, M2, Chp)
        pooled1 = jnp.maximum(jnp.maximum(h1[0], h1[1]),
                              jnp.maximum(h1[2], h1[3]))       # (M2, Chp)
        pooled1 = pooled1.reshape(Nb, H2, W2, Chp)

        # ---- padded conv2 input: zero only the 1-px border, ONE wide interior store ----
        zrow = jnp.zeros((Nb, W2 + 2, Chp), jnp.float32)
        zcol = jnp.zeros((Nb, H2 + 2, Chp), jnp.float32)
        pad_ref[:, 0, :, :] = zrow
        pad_ref[:, H2 + 1, :, :] = zrow
        pad_ref[:, :, 0, :] = zcol
        pad_ref[:, :, W2 + 1, :] = zcol
        pad_ref[:, 1:H2 + 1, 1:W2 + 1, :] = pooled1

        # ---- conv block 2: 9 accumulating MXU matmuls, K = Chp per tap (no concat/relayout) ----
        acc = jnp.zeros((M2, Chp), jnp.float32)
        for t in range(9):
            dy, dx = divmod(t, 3)
            tap = pad_ref[:, dy:dy + H2, dx:dx + W2, :]        # (Nb, H2, W2, Chp) unit-stride
            tap2d = tap.reshape(M2, Chp).astype(jnp.bfloat16)  # free merge (W2 == 8)
            acc = acc + jnp.dot(tap2d, w2_ref[t], preferred_element_type=jnp.float32)
        h2 = jnp.maximum(acc + b2_ref[...], 0.0).reshape(Nb, H2, W2, Chp)

        # ---- maxpool2 + flatten: only 128-lane-aligned slices / concat ----
        pieces = []
        for i in range(H4):
            row = jnp.maximum(h2[:, 2 * i], h2[:, 2 * i + 1])  # (Nb, W2, Chp)
            for j in range(W4):
                pieces.append(jnp.maximum(row[:, 2 * j], row[:, 2 * j + 1]))  # (Nb, Chp)
        feats = jnp.concatenate(pieces, axis=-1).astype(jnp.bfloat16)          # (Nb, H4*W4*Chp)

        # ---- classifier: bf16 matmul (f32 acc) + bias + sigmoid, lane-dense output block ----
        logits = jnp.dot(feats, wl_ref[...], preferred_element_type=jnp.float32) + bl_ref[...]
        out_ref[:, 0, :] = 1.0 / (1.0 + jnp.exp(-logits))

    return kernel


def model_forward(x_nchw, params, n_blk=None):
    N, Cin, H, W = x_nchw.shape
    assert H % 4 == 0 and W % 4 == 0, "spatial dims must be divisible by 4 (two 2x2 pools)"
    Ch = params["w1"].shape[0]
    out_f = params["wl"].shape[0]
    H2, W2 = H // 2, W // 2
    H4, W4 = H2 // 2, W2 // 2
    K1 = 9 * Cin
    Chp = 128          # hidden channels zero-padded to full lane width
    OUTP = 128         # classifier output zero-padded to full lane width (lane-dense store)
    assert Ch <= Chp and out_f <= OUTP
    assert params["wl"].shape[1] == Ch * H4 * W4
    if n_blk is None:
        n_blk = min(N, 8)
    assert N % n_blk == 0

    # --- input: NCHW -> NHWC, pad, im2col + pool-window-major row order, bf16 (layout plumbing)
    x = jnp.transpose(x_nchw, (0, 2, 3, 1)).astype(jnp.float32)
    xp = jnp.pad(x, ((0, 0), (1, 1), (1, 1), (0, 0)))
    taps = [xp[:, dy:dy + H, dx:dx + W, :] for dy in range(3) for dx in range(3)]
    pat = jnp.concatenate(taps, axis=-1)                      # (N, H, W, 9*Cin), K=(dy,dx,ci)
    pat = pat.reshape(N, H2, 2, W2, 2, K1)                    # (n, y2, py, x2, px, K)
    pat = jnp.transpose(pat, (2, 4, 0, 1, 3, 5))              # (py, px, n, y2, x2, K)
    patches1 = pat.reshape(4, N, H2 * W2, K1).astype(jnp.bfloat16)

    # --- conv weights: OIHW -> (ky, kx, ci, co), channel-pad to Chp, bf16
    w1 = jnp.transpose(params["w1"], (2, 3, 1, 0)).reshape(K1, Ch)
    w1p = jnp.zeros((K1, Chp), jnp.float32).at[:, :Ch].set(w1).astype(jnp.bfloat16)
    b1p = jnp.zeros((1, Chp), jnp.float32).at[:, :Ch].set(params["b1"])

    w2 = jnp.transpose(params["w2"], (2, 3, 1, 0)).reshape(9, Ch, Ch)
    w2p = jnp.zeros((9, Chp, Chp), jnp.float32).at[:, :Ch, :Ch].set(w2).astype(jnp.bfloat16)
    b2p = jnp.zeros((1, Chp), jnp.float32).at[:, :Ch].set(params["b2"])

    # --- classifier: PyTorch flattens NCHW (c,i,j); kernel flattens (i,j,c_padded); fold the
    #     channel un-pad and the output pad into the pre-permuted weight.
    wl = params["wl"].reshape(out_f, Ch, H4, W4)
    wl = jnp.transpose(wl, (2, 3, 1, 0))                      # (H4, W4, Ch, out_f)
    wlp = jnp.zeros((H4, W4, Chp, OUTP), jnp.float32).at[:, :, :Ch, :out_f].set(wl)
    wlp = wlp.reshape(H4 * W4 * Chp, OUTP).astype(jnp.bfloat16)
    blp = jnp.zeros((1, OUTP), jnp.float32).at[:, :out_f].set(params["bl"])

    kernel = _make_kernel(n_blk, H, W, Cin, Chp)

    out = pl.pallas_call(
        kernel,
        out_shape=jax.ShapeDtypeStruct((N, 1, OUTP), jnp.float32),
        grid_spec=pltpu.PrefetchScalarGridSpec(
            num_scalar_prefetch=0,
            grid=(N // n_blk,),                               # batch-tiled, pipelined
            in_specs=[
                pl.BlockSpec((4, n_blk, H2 * W2, K1), lambda i: (0, i, 0, 0)),
                pl.BlockSpec((K1, Chp), lambda i: (0, 0)),            # weights: constant block
                pl.BlockSpec((1, Chp), lambda i: (0, 0)),
                pl.BlockSpec((9, Chp, Chp), lambda i: (0, 0, 0)),
                pl.BlockSpec((1, Chp), lambda i: (0, 0)),
                pl.BlockSpec((H4 * W4 * Chp, OUTP), lambda i: (0, 0)),
                pl.BlockSpec((1, OUTP), lambda i: (0, 0)),
            ],
            out_specs=pl.BlockSpec((n_blk, 1, OUTP), lambda i: (i, 0, 0)),
            scratch_shapes=[
                pltpu.VMEM((n_blk, H2 + 2, W2 + 2, Chp), jnp.float32),  # padded conv2 input
            ],
        ),
        compiler_params=pltpu.CompilerParams(
            dimension_semantics=("parallel",)),               # shards batch steps on v7x megacore
    )(patches1, w1p, b1p, w2p, b2p, wlp, blp)

    return out[:, 0, :out_f]


def init_params(key, in_ch, hidden, out_f, h, w):
    ks = jax.random.split(key, 6)

    def nrm(k, shape, s=0.1):
        return s * jax.random.normal(k, shape, dtype=jnp.float32)

    feat = hidden * (h // 4) * (w // 4)
    return {
        "w1": nrm(ks[0], (hidden, in_ch, 3, 3)),
        "b1": nrm(ks[1], (hidden,)),
        "w2": nrm(ks[2], (hidden, hidden, 3, 3)),
        "b2": nrm(ks[3], (hidden,)),
        "wl": nrm(ks[4], (out_f, feat)),     # LazyLinear resolved statically at init
        "bl": nrm(ks[5], (out_f,)),
    }


def ref_forward(x, p):
    """Pure-JAX NCHW reference mirroring the PyTorch module (f32)."""
    def conv3x3(x, w, b):
        y = lax.conv_general_dilated(
            x, w, window_strides=(1, 1), padding=[(1, 1), (1, 1)],
            dimension_numbers=("NCHW", "OIHW", "NCHW"))
        return y + b[None, :, None, None]

    def maxpool2(x):
        n, c, h, w = x.shape
        return x.reshape(n, c, h // 2, 2, w // 2, 2).max(axis=(3, 5))

    h = maxpool2(jnp.maximum(conv3x3(x, p["w1"], p["b1"]), 0.0))
    h = maxpool2(jnp.maximum(conv3x3(h, p["w2"], p["b2"]), 0.0))
    f = h.reshape(h.shape[0], -1)                        # PyTorch NCHW flatten
    logits = f @ p["wl"].T + p["bl"]
    return 1.0 / (1.0 + jnp.exp(-logits))


if __name__ == "__main__":
    key = jax.random.PRNGKey(0)
    kx, kp = jax.random.split(key)

    N, Cin, H, W = 2, 4, 16, 16
    hidden_units, output_shape = 32, 10

    x = jax.random.normal(kx, (N, Cin, H, W), dtype=jnp.float32)
    params = init_params(kp, Cin, hidden_units, output_shape, H, W)

    # n_blk=1 -> grid=(2,): exercises the batch-tiled, pipelined, "parallel" grid.
    fwd = jax.jit(model_forward, static_argnames=("n_blk",))
    y = fwd(x, params, n_blk=1)
    y = jax.block_until_ready(y)

    y_ref = ref_forward(x, params)
    assert y.shape == (N, output_shape)
    # tolerance reflects bf16 MXU operands (conv1/conv2/classifier) with f32 accumulation
    np.testing.assert_allclose(np.asarray(y), np.asarray(y_ref), atol=2e-2, rtol=2e-2)
    print("KERNEL_OK")
</pallas_src>

<mosaic_0001>
module attributes {stable_mosaic.version = 11 : i64} {
  func.func @kernel(%arg0: i32, %arg1: memref<4x1x64x36xbf16, #tpu.memory_space<vmem>>, %arg2: memref<36x128xbf16, #tpu.memory_space<vmem>>, %arg3: memref<1x128xf32, #tpu.memory_space<vmem>>, %arg4: memref<9x128x128xbf16, #tpu.memory_space<vmem>>, %arg5: memref<1x128xf32, #tpu.memory_space<vmem>>, %arg6: memref<2048x128xbf16, #tpu.memory_space<vmem>>, %arg7: memref<1x128xf32, #tpu.memory_space<vmem>>, %arg8: memref<1x1x128xf32, #tpu.memory_space<vmem>>, %arg9: memref<1x10x10x128xf32, #tpu.memory_space<vmem>>) attributes {dimension_semantics = [#tpu.dimension_semantics<parallel>], iteration_bounds = array<i64: 2>, scalar_prefetch = 0 : i64, scratch_operands = 1 : i64, tpu.core_type = #tpu.core_type<tc>, window_params = [{transform_indices = @transform_0, window_bounds = array<i64: 4, 1, 64, 36>}, {pipeline_mode = #tpu.pipeline_mode<synchronous>, transform_indices = @transform_1, window_bounds = array<i64: 36, 128>}, {pipeline_mode = #tpu.pipeline_mode<synchronous>, transform_indices = @transform_2, window_bounds = array<i64: 1, 128>}, {pipeline_mode = #tpu.pipeline_mode<synchronous>, transform_indices = @transform_3, window_bounds = array<i64: 9, 128, 128>}, {pipeline_mode = #tpu.pipeline_mode<synchronous>, transform_indices = @transform_4, window_bounds = array<i64: 1, 128>}, {pipeline_mode = #tpu.pipeline_mode<synchronous>, transform_indices = @transform_5, window_bounds = array<i64: 2048, 128>}, {pipeline_mode = #tpu.pipeline_mode<synchronous>, transform_indices = @transform_6, window_bounds = array<i64: 1, 128>}, {transform_indices = @transform_7, window_bounds = array<i64: 1, 1, 128>}]} {
    %c0 = arith.constant 0 : index
    %c0_0 = arith.constant 0 : index
    %c0_1 = arith.constant 0 : index
    %c0_2 = arith.constant 0 : index
    %0 = vector.load %arg1[%c0, %c0_0, %c0_1, %c0_2] : memref<4x1x64x36xbf16, #tpu.memory_space<vmem>>, vector<4x1x64x36xbf16>
    %1 = vector.shape_cast %0 : vector<4x1x64x36xbf16> to vector<256x36xbf16>
    %c0_3 = arith.constant 0 : index
    %c0_4 = arith.constant 0 : index
    %2 = vector.load %arg2[%c0_3, %c0_4] : memref<36x128xbf16, #tpu.memory_space<vmem>>, vector<36x128xbf16>
    %cst = arith.constant dense<0.000000e+00> : vector<256x128xf32>
    %3 = tpu.matmul %1, %2, %cst {dimension_numbers = #tpu.dot_dimension_numbers<[1], [0], [0], [1], [0, 0, 1, 1], [], []>} : vector<256x36xbf16>, vector<36x128xbf16>, vector<256x128xf32> -> vector<256x128xf32>
    %c0_5 = arith.constant 0 : index
    %c0_6 = arith.constant 0 : index
    %4 = vector.load %arg3[%c0_5, %c0_6] : memref<1x128xf32, #tpu.memory_space<vmem>>, vector<1x128xf32>
    %5 = vector.broadcast %4 : vector<1x128xf32> to vector<256x128xf32>
    %6 = arith.addf %3, %5 : vector<256x128xf32>
    %cst_7 = arith.constant 0.000000e+00 : f32
    %7 = vector.broadcast %cst_7 : f32 to vector<256x128xf32>
    %8 = arith.maximumf %6, %7 : vector<256x128xf32>
    %9 = vector.shape_cast %8 : vector<256x128xf32> to vector<4x64x128xf32>
    %10 = vector.extract_strided_slice %9 {offsets = [0, 0, 0], sizes = [1, 64, 128], strides = [1, 1, 1]} : vector<4x64x128xf32> to vector<1x64x128xf32>
    %11 = vector.shape_cast %10 : vector<1x64x128xf32> to vector<64x128xf32>
    %12 = vector.extract_strided_slice %9 {offsets = [1, 0, 0], sizes = [1, 64, 128], strides = [1, 1, 1]} : vector<4x64x128xf32> to vector<1x64x128xf32>
    %13 = vector.shape_cast %12 : vector<1x64x128xf32> to vector<64x128xf32>
    %14 = arith.maximumf %11, %13 : vector<64x128xf32>
    %15 = vector.extract_strided_slice %9 {offsets = [2, 0, 0], sizes = [1, 64, 128], strides = [1, 1, 1]} : vector<4x64x128xf32> to vector<1x64x128xf32>
    %16 = vector.shape_cast %15 : vector<1x64x128xf32> to vector<64x128xf32>
    %17 = vector.extract_strided_slice %9 {offsets = [3, 0, 0], sizes = [1, 64, 128], strides = [1, 1, 1]} : vector<4x64x128xf32> to vector<1x64x128xf32>
    %18 = vector.shape_cast %17 : vector<1x64x128xf32> to vector<64x128xf32>
    %19 = arith.maximumf %16, %18 : vector<64x128xf32>
    %20 = arith.maximumf %14, %19 : vector<64x128xf32>
    %21 = vector.shape_cast %20 : vector<64x128xf32> to vector<1x8x8x128xf32>
    %cst_8 = arith.constant 0.000000e+00 : f32
    %22 = vector.broadcast %cst_8 : f32 to vector<1x10x128xf32>
    %cst_9 = arith.constant 0.000000e+00 : f32
    %23 = vector.broadcast %cst_9 : f32 to vector<1x10x128xf32>
    %c0_10 = arith.constant 0 : index
    %c0_11 = arith.constant 0 : index
    %c0_12 = arith.constant 0 : index
    %c0_13 = arith.constant 0 : index
    %24 = vector.load %arg9[%c0_10, %c0_11, %c0_12, %c0_13] : memref<1x10x10x128xf32, #tpu.memory_space<vmem>>, vector<1x1x10x128xf32>
    %25 = vector.shape_cast %24 : vector<1x1x10x128xf32> to vector<1x10x128xf32>
    %26 = vector.shape_cast %22 : vector<1x10x128xf32> to vector<1x1x10x128xf32>
    tpu.vector_store %arg9[%c0_10, %c0_11, %c0_12, %c0_13], %26 {strides = array<i32>} : memref<1x10x10x128xf32, #tpu.memory_space<vmem>>, vector<1x1x10x128xf32>,
    %c0_14 = arith.constant 0 : index
    %c9 = arith.constant 9 : index
    %c0_15 = arith.constant 0 : index
    %c0_16 = arith.constant 0 : index
    %27 = vector.load %arg9[%c0_14, %c9, %c0_15, %c0_16] : memref<1x10x10x128xf32, #tpu.memory_space<vmem>>, vector<1x1x10x128xf32>
    %28 = vector.shape_cast %27 : vector<1x1x10x128xf32> to vector<1x10x128xf32>
    %29 = vector.shape_cast %22 : vector<1x10x128xf32> to vector<1x1x10x128xf32>
    tpu.vector_store %arg9[%c0_14, %c9, %c0_15, %c0_16], %29 {strides = array<i32>} : memref<1x10x10x128xf32, #tpu.memory_space<vmem>>, vector<1x1x10x128xf32>,
    %c0_17 = arith.constant 0 : index
    %c0_18 = arith.constant 0 : index
    %c0_19 = arith.constant 0 : index
    %c0_20 = arith.constant 0 : index
    %30 = vector.load %arg9[%c0_17, %c0_18, %c0_19, %c0_20] : memref<1x10x10x128xf32, #tpu.memory_space<vmem>>, vector<1x10x1x128xf32>
    %31 = vector.shape_cast %30 : vector<1x10x1x128xf32> to vector<1x10x128xf32>
    %32 = vector.shape_cast %23 : vector<1x10x128xf32> to vector<1x10x1x128xf32>
    tpu.vector_store %arg9[%c0_17, %c0_18, %c0_19, %c0_20], %32 {strides = array<i32>} : memref<1x10x10x128xf32, #tpu.memory_space<vmem>>, vector<1x10x1x128xf32>,
    %c0_21 = arith.constant 0 : index
    %c0_22 = arith.constant 0 : index
    %c9_23 = arith.constant 9 : index
    %c0_24 = arith.constant 0 : index
    %33 = vector.load %arg9[%c0_21, %c0_22, %c9_23, %c0_24] : memref<1x10x10x128xf32, #tpu.memory_space<vmem>>, vector<1x10x1x128xf32>
    %34 = vector.shape_cast %33 : vector<1x10x1x128xf32> to vector<1x10x128xf32>
    %35 = vector.shape_cast %23 : vector<1x10x128xf32> to vector<1x10x1x128xf32>
    tpu.vector_store %arg9[%c0_21, %c0_22, %c9_23, %c0_24], %35 {strides = array<i32>} : memref<1x10x10x128xf32, #tpu.memory_space<vmem>>, vector<1x10x1x128xf32>,
    %c0_25 = arith.constant 0 : index
    %c1 = arith.constant 1 : index
    %c1_26 = arith.constant 1 : index
    %c0_27 = arith.constant 0 : index
    %36 = vector.load %arg9[%c0_25, %c1, %c1_26, %c0_27] : memref<1x10x10x128xf32, #tpu.memory_space<vmem>>, vector<1x8x8x128xf32>
    tpu.vector_store %arg9[%c0_25, %c1, %c1_26, %c0_27], %21 {strides = array<i32>} : memref<1x10x10x128xf32, #tpu.memory_space<vmem>>, vector<1x8x8x128xf32>,
    %cst_28 = arith.constant 0.000000e+00 : f32
    %37 = vector.broadcast %cst_28 : f32 to vector<64x128xf32>
    %c0_29 = arith.constant 0 : index
    %c0_30 = arith.constant 0 : index
    %c0_31 = arith.constant 0 : index
    %c0_32 = arith.constant 0 : index
    %38 = vector.load %arg9[%c0_29, %c0_30, %c0_31, %c0_32] : memref<1x10x10x128xf32, #tpu.memory_space<vmem>>, vector<1x8x8x128xf32>
    %39 = vector.shape_cast %38 : vector<1x8x8x128xf32> to vector<64x128xf32>
    %40 = arith.truncf %39 : vector<64x128xf32> to vector<64x128xbf16>
    %c0_33 = arith.constant 0 : index
    %c0_34 = arith.constant 0 : index
    %c0_35 = arith.constant 0 : index
    %41 = vector.load %arg4[%c0_33, %c0_34, %c0_35] : memref<9x128x128xbf16, #tpu.memory_space<vmem>>, vector<1x128x128xbf16>
    %42 = vector.shape_cast %41 : vector<1x128x128xbf16> to vector<128x128xbf16>
    %cst_36 = arith.constant dense<0.000000e+00> : vector<64x128xf32>
    %43 = tpu.matmul %40, %42, %cst_36 {dimension_numbers = #tpu.dot_dimension_numbers<[1], [0], [0], [1], [0, 0, 1, 1], [], []>} : vector<64x128xbf16>, vector<128x128xbf16>, vector<64x128xf32> -> vector<64x128xf32>
    %44 = arith.addf %37, %43 : vector<64x128xf32>
    %c0_37 = arith.constant 0 : index
    %c0_38 = arith.constant 0 : index
    %c1_39 = arith.constant 1 : index
    %c0_40 = arith.constant 0 : index
    %45 = vector.load %arg9[%c0_37, %c0_38, %c1_39, %c0_40] : memref<1x10x10x128xf32, #tpu.memory_space<vmem>>, vector<1x8x8x128xf32>
    %46 = vector.shape_cast %45 : vector<1x8x8x128xf32> to vector<64x128xf32>
    %47 = arith.truncf %46 : vector<64x128xf32> to vector<64x128xbf16>
    %c1_41 = arith.constant 1 : index
    %c0_42 = arith.constant 0 : index
    %c0_43 = arith.constant 0 : index
    %48 = vector.load %arg4[%c1_41, %c0_42, %c0_43] : memref<9x128x128xbf16, #tpu.memory_space<vmem>>, vector<1x128x128xbf16>
    %49 = vector.shape_cast %48 : vector<1x128x128xbf16> to vector<128x128xbf16>
    %cst_44 = arith.constant dense<0.000000e+00> : vector<64x128xf32>
    %50 = tpu.matmul %47, %49, %cst_44 {dimension_numbers = #tpu.dot_dimension_numbers<[1], [0], [0], [1], [0, 0, 1, 1], [], []>} : vector<64x128xbf16>, vector<128x128xbf16>, vector<64x128xf32> -> vector<64x128xf32>
    %51 = arith.addf %44, %50 : vector<64x128xf32>
    %c0_45 = arith.constant 0 : index
    %c0_46 = arith.constant 0 : index
    %c2 = arith.constant 2 : index
    %c0_47 = arith.constant 0 : index
    %52 = vector.load %arg9[%c0_45, %c0_46, %c2, %c0_47] : memref<1x10x10x128xf32, #tpu.memory_space<vmem>>, vector<1x8x8x128xf32>
    %53 = vector.shape_cast %52 : vector<1x8x8x128xf32> to vector<64x128xf32>
    %54 = arith.truncf %53 : vector<64x128xf32> to vector<64x128xbf16>
    %c2_48 = arith.constant 2 : index
    %c0_49 = arith.constant 0 : index
    %c0_50 = arith.constant 0 : index
    %55 = vector.load %arg4[%c2_48, %c0_49, %c0_50] : memref<9x128x128xbf16, #tpu.memory_space<vmem>>, vector<1x128x128xbf16>
    %56 = vector.shape_cast %55 : vector<1x128x128xbf16> to vector<128x128xbf16>
    %cst_51 = arith.constant dense<0.000000e+00> : vector<64x128xf32>
    %57 = tpu.matmul %54, %56, %cst_51 {dimension_numbers = #tpu.dot_dimension_numbers<[1], [0], [0], [1], [0, 0, 1, 1], [], []>} : vector<64x128xbf16>, vector<128x128xbf16>, vector<64x128xf32> -> vector<64x128xf32>
    %58 = arith.addf %51, %57 : vector<64x128xf32>
    %c0_52 = arith.constant 0 : index
    %c1_53 = arith.constant 1 : index
    %c0_54 = arith.constant 0 : index
    %c0_55 = arith.constant 0 : index
    %59 = vector.load %arg9[%c0_52, %c1_53, %c0_54, %c0_55] : memref<1x10x10x128xf32, #tpu.memory_space<vmem>>, vector<1x8x8x128xf32>
    %60 = vector.shape_cast %59 : vector<1x8x8x128xf32> to vector<64x128xf32>
    %61 = arith.truncf %60 : vector<64x128xf32> to vector<64x128xbf16>
    %c3 = arith.constant 3 : index
    %c0_56 = arith.constant 0 : index
    %c0_57 = arith.constant 0 : index
    %62 = vector.load %arg4[%c3, %c0_56, %c0_57] : memref<9x128x128xbf16, #tpu.memory_space<vmem>>, vector<1x128x128xbf16>
    %63 = vector.shape_cast %62 : vector<1x128x128xbf16> to vector<128x128xbf16>
    %cst_58 = arith.constant dense<0.000000e+00> : vector<64x128xf32>
    %64 = tpu.matmul %61, %63, %cst_58 {dimension_numbers = #tpu.dot_dimension_numbers<[1], [0], [0], [1], [0, 0, 1, 1], [], []>} : vector<64x128xbf16>, vector<128x128xbf16>, vector<64x128xf32> -> vector<64x128xf32>
    %65 = arith.addf %58, %64 : vector<64x128xf32>
    %c0_59 = arith.constant 0 : index
    %c1_60 = arith.constant 1 : index
    %c1_61 = arith.constant 1 : index
    %c0_62 = arith.constant 0 : index
    %66 = vector.load %arg9[%c0_59, %c1_60, %c1_61, %c0_62] : memref<1x10x10x128xf32, #tpu.memory_space<vmem>>, vector<1x8x8x128xf32>
    %67 = vector.shape_cast %66 : vector<1x8x8x128xf32> to vector<64x128xf32>
    %68 = arith.truncf %67 : vector<64x128xf32> to vector<64x128xbf16>
    %c4 = arith.constant 4 : index
    %c0_63 = arith.constant 0 : index
    %c0_64 = arith.constant 0 : index
    %69 = vector.load %arg4[%c4, %c0_63, %c0_64] : memref<9x128x128xbf16, #tpu.memory_space<vmem>>, vector<1x128x128xbf16>
    %70 = vector.shape_cast %69 : vector<1x128x128xbf16> to vector<128x128xbf16>
    %cst_65 = arith.constant dense<0.000000e+00> : vector<64x128xf32>
    %71 = tpu.matmul %68, %70, %cst_65 {dimension_numbers = #tpu.dot_dimension_numbers<[1], [0], [0], [1], [0, 0, 1, 1], [], []>} : vector<64x128xbf16>, vector<128x128xbf16>, vector<64x128xf32> -> vector<64x128xf32>
    %72 = arith.addf %65, %71 : vector<64x128xf32>
    %c0_66 = arith.constant 0 : index
    %c1_67 = arith.constant 1 : index
    %c2_68 = arith.constant 2 : index
    %c0_69 = arith.constant 0 : index
    %73 = vector.load %arg9[%c0_66, %c1_67, %c2_68, %c0_69] : memref<1x10x10x128xf32, #tpu.memory_space<vmem>>, vector<1x8x8x128xf32>
    %74 = vector.shape_cast %73 : vector<1x8x8x128xf32> to vector<64x128xf32>
    %75 = arith.truncf %74 : vector<64x128xf32> to vector<64x128xbf16>
    %c5 = arith.constant 5 : index
    %c0_70 = arith.constant 0 : index
    %c0_71 = arith.constant 0 : index
    %76 = vector.load %arg4[%c5, %c0_70, %c0_71] : memref<9x128x128xbf16, #tpu.memory_space<vmem>>, vector<1x128x128xbf16>
    %77 = vector.shape_cast %76 : vector<1x128x128xbf16> to vector<128x128xbf16>
    %cst_72 = arith.constant dense<0.000000e+00> : vector<64x128xf32>
    %78 = tpu.matmul %75, %77, %cst_72 {dimension_numbers = #tpu.dot_dimension_numbers<[1], [0], [0], [1], [0, 0, 1, 1], [], []>} : vector<64x128xbf16>, vector<128x128xbf16>, vector<64x128xf32> -> vector<64x128xf32>
    %79 = arith.addf %72, %78 : vector<64x128xf32>
    %c0_73 = arith.constant 0 : index
    %c2_74 = arith.constant 2 : index
    %c0_75 = arith.constant 0 : index
    %c0_76 = arith.constant 0 : index
    %80 = vector.load %arg9[%c0_73, %c2_74, %c0_75, %c0_76] : memref<1x10x10x128xf32, #tpu.memory_space<vmem>>, vector<1x8x8x128xf32>
    %81 = vector.shape_cast %80 : vector<1x8x8x128xf32> to vector<64x128xf32>
    %82 = arith.truncf %81 : vector<64x128xf32> to vector<64x128xbf16>
    %c6 = arith.constant 6 : index
    %c0_77 = arith.constant 0 : index
    %c0_78 = arith.constant 0 : index
    %83 = vector.load %arg4[%c6, %c0_77, %c0_78] : memref<9x128x128xbf16, #tpu.memory_space<vmem>>, vector<1x128x128xbf16>
    %84 = vector.shape_cast %83 : vector<1x128x128xbf16> to vector<128x128xbf16>
    %cst_79 = arith.constant dense<0.000000e+00> : vector<64x128xf32>
    %85 = tpu.matmul %82, %84, %cst_79 {dimension_numbers = #tpu.dot_dimension_numbers<[1], [0], [0], [1], [0, 0, 1, 1], [], []>} : vector<64x128xbf16>, vector<128x128xbf16>, vector<64x128xf32> -> vector<64x128xf32>
    %86 = arith.addf %79, %85 : vector<64x128xf32>
    %c0_80 = arith.constant 0 : index
    %c2_81 = arith.constant 2 : index
    %c1_82 = arith.constant 1 : index
    %c0_83 = arith.constant 0 : index
    %87 = vector.load %arg9[%c0_80, %c2_81, %c1_82, %c0_83] : memref<1x10x10x128xf32, #tpu.memory_space<vmem>>, vector<1x8x8x128xf32>
    %88 = vector.shape_cast %87 : vector<1x8x8x128xf32> to vector<64x128xf32>
    %89 = arith.truncf %88 : vector<64x128xf32> to vector<64x128xbf16>
    %c7 = arith.constant 7 : index
    %c0_84 = arith.constant 0 : index
    %c0_85 = arith.constant 0 : index
    %90 = vector.load %arg4[%c7, %c0_84, %c0_85] : memref<9x128x128xbf16, #tpu.memory_space<vmem>>, vector<1x128x128xbf16>
    %91 = vector.shape_cast %90 : vector<1x128x128xbf16> to vector<128x128xbf16>
    %cst_86 = arith.constant dense<0.000000e+00> : vector<64x128xf32>
    %92 = tpu.matmul %89, %91, %cst_86 {dimension_numbers = #tpu.dot_dimension_numbers<[1], [0], [0], [1], [0, 0, 1, 1], [], []>} : vector<64x128xbf16>, vector<128x128xbf16>, vector<64x128xf32> -> vector<64x128xf32>
    %93 = arith.addf %86, %92 : vector<64x128xf32>
    %c0_87 = arith.constant 0 : index
    %c2_88 = arith.constant 2 : index
    %c2_89 = arith.constant 2 : index
    %c0_90 = arith.constant 0 : index
    %94 = vector.load %arg9[%c0_87, %c2_88, %c2_89, %c0_90] : memref<1x10x10x128xf32, #tpu.memory_space<vmem>>, vector<1x8x8x128xf32>
    %95 = vector.shape_cast %94 : vector<1x8x8x128xf32> to vector<64x128xf32>
    %96 = arith.truncf %95 : vector<64x128xf32> to vector<64x128xbf16>
    %c8 = arith.constant 8 : index
    %c0_91 = arith.constant 0 : index
    %c0_92 = arith.constant 0 : index
    %97 = vector.load %arg4[%c8, %c0_91, %c0_92] : memref<9x128x128xbf16, #tpu.memory_space<vmem>>, vector<1x128x128xbf16>
    %98 = vector.shape_cast %97 : vector<1x128x128xbf16> to vector<128x128xbf16>
    %cst_93 = arith.constant dense<0.000000e+00> : vector<64x128xf32>
    %99 = tpu.matmul %96, %98, %cst_93 {dimension_numbers = #tpu.dot_dimension_numbers<[1], [0], [0], [1], [0, 0, 1, 1], [], []>} : vector<64x128xbf16>, vector<128x128xbf16>, vector<64x128xf32> -> vector<64x128xf32>
    %100 = arith.addf %93, %99 : vector<64x128xf32>
    %c0_94 = arith.constant 0 : index
    %c0_95 = arith.constant 0 : index
    %101 = vector.load %arg5[%c0_94, %c0_95] : memref<1x128xf32, #tpu.memory_space<vmem>>, vector<1x128xf32>
    %102 = vector.broadcast %101 : vector<1x128xf32> to vector<64x128xf32>
    %103 = arith.addf %100, %102 : vector<64x128xf32>
    %cst_96 = arith.constant 0.000000e+00 : f32
    %104 = vector.broadcast %cst_96 : f32 to vector<64x128xf32>
    %105 = arith.maximumf %103, %104 : vector<64x128xf32>
    %106 = vector.shape_cast %105 : vector<64x128xf32> to vector<1x8x8x128xf32>
    %107 = vector.extract_strided_slice %106 {offsets = [0, 0, 0, 0], sizes = [1, 1, 8, 128], strides = [1, 1, 1, 1]} : vector<1x8x8x128xf32> to vector<1x1x8x128xf32>
    %108 = vector.shape_cast %107 : vector<1x1x8x128xf32> to vector<1x8x128xf32>
    %109 = vector.extract_strided_slice %106 {offsets = [0, 1, 0, 0], sizes = [1, 1, 8, 128], strides = [1, 1, 1, 1]} : vector<1x8x8x128xf32> to vector<1x1x8x128xf32>
    %110 = vector.shape_cast %109 : vector<1x1x8x128xf32> to vector<1x8x128xf32>
    %111 = arith.maximumf %108, %110 : vector<1x8x128xf32>
    %112 = vector.extract_strided_slice %111 {offsets = [0, 0, 0], sizes = [1, 1, 128], strides = [1, 1, 1]} : vector<1x8x128xf32> to vector<1x1x128xf32>
    %113 = vector.shape_cast %112 : vector<1x1x128xf32> to vector<1x128xf32>
    %114 = vector.extract_strided_slice %111 {offsets = [0, 1, 0], sizes = [1, 1, 128], strides = [1, 1, 1]} : vector<1x8x128xf32> to vector<1x1x128xf32>
    %115 = vector.shape_cast %114 : vector<1x1x128xf32> to vector<1x128xf32>
    %116 = arith.maximumf %113, %115 : vector<1x128xf32>
    %117 = vector.extract_strided_slice %111 {offsets = [0, 2, 0], sizes = [1, 1, 128], strides = [1, 1, 1]} : vector<1x8x128xf32> to vector<1x1x128xf32>
    %118 = vector.shape_cast %117 : vector<1x1x128xf32> to vector<1x128xf32>
    %119 = vector.extract_strided_slice %111 {offsets = [0, 3, 0], sizes = [1, 1, 128], strides = [1, 1, 1]} : vector<1x8x128xf32> to vector<1x1x128xf32>
    %120 = vector.shape_cast %119 : vector<1x1x128xf32> to vector<1x128xf32>
    %121 = arith.maximumf %118, %120 : vector<1x128xf32>
    %122 = vector.extract_strided_slice %111 {offsets = [0, 4, 0], sizes = [1, 1, 128], strides = [1, 1, 1]} : vector<1x8x128xf32> to vector<1x1x128xf32>
    %123 = vector.shape_cast %122 : vector<1x1x128xf32> to vector<1x128xf32>
    %124 = vector.extract_strided_slice %111 {offsets = [0, 5, 0], sizes = [1, 1, 128], strides = [1, 1, 1]} : vector<1x8x128xf32> to vector<1x1x128xf32>
    %125 = vector.shape_cast %124 : vector<1x1x128xf32> to vector<1x128xf32>
    %126 = arith.maximumf %123, %125 : vector<1x128xf32>
    %127 = vector.extract_strided_slice %111 {offsets = [0, 6, 0], sizes = [1, 1, 128], strides = [1, 1, 1]} : vector<1x8x128xf32> to vector<1x1x128xf32>
    %128 = vector.shape_cast %127 : vector<1x1x128xf32> to vector<1x128xf32>
    %129 = vector.extract_strided_slice %111 {offsets = [0, 7, 0], sizes = [1, 1, 128], strides = [1, 1, 1]} : vector<1x8x128xf32> to vector<1x1x128xf32>
    %130 = vector.shape_cast %129 : vector<1x1x128xf32> to vector<1x128xf32>
    %131 = arith.maximumf %128, %130 : vector<1x128xf32>
    %132 = vector.extract_strided_slice %106 {offsets = [0, 2, 0, 0], sizes = [1, 1, 8, 128], strides = [1, 1, 1, 1]} : vector<1x8x8x128xf32> to vector<1x1x8x128xf32>
    %133 = vector.shape_cast %132 : vector<1x1x8x128xf32> to vector<1x8x128xf32>
    %134 = vector.extract_strided_slice %106 {offsets = [0, 3, 0, 0], sizes = [1, 1, 8, 128], strides = [1, 1, 1, 1]} : vector<1x8x8x128xf32> to vector<1x1x8x128xf32>
    %135 = vector.shape_cast %134 : vector<1x1x8x128xf32> to vector<1x8x128xf32>
    %136 = arith.maximumf %133, %135 : vector<1x8x128xf32>
    %137 = vector.extract_strided_slice %136 {offsets = [0, 0, 0], sizes = [1, 1, 128], strides = [1, 1, 1]} : vector<1x8x128xf32> to vector<1x1x128xf32>
    %138 = vector.shape_cast %137 : vector<1x1x128xf32> to vector<1x128xf32>
    %139 = vector.extract_strided_slice %136 {offsets = [0, 1, 0], sizes = [1, 1, 128], strides = [1, 1, 1]} : vector<1x8x128xf32> to vector<1x1x128xf32>
    %140 = vector.shape_cast %139 : vector<1x1x128xf32> to vector<1x128xf32>
    %141 = arith.maximumf %138, %140 : vector<1x128xf32>
    %142 = vector.extract_strided_slice %136 {offsets = [0, 2, 0], sizes = [1, 1, 128], strides = [1, 1, 1]} : vector<1x8x128xf32> to vector<1x1x128xf32>
    %143 = vector.shape_cast %142 : vector<1x1x128xf32> to vector<1x128xf32>
    %144 = vector.extract_strided_slice %136 {offsets = [0, 3, 0], sizes = [1, 1, 128], strides = [1, 1, 1]} : vector<1x8x128xf32> to vector<1x1x128xf32>
    %145 = vector.shape_cast %144 : vector<1x1x128xf32> to vector<1x128xf32>
    %146 = arith.maximumf %143, %145 : vector<1x128xf32>
    %147 = vector.extract_strided_slice %136 {offsets = [0, 4, 0], sizes = [1, 1, 128], strides = [1, 1, 1]} : vector<1x8x128xf32> to vector<1x1x128xf32>
    %148 = vector.shape_cast %147 : vector<1x1x128xf32> to vector<1x128xf32>
    %149 = vector.extract_strided_slice %136 {offsets = [0, 5, 0], sizes = [1, 1, 128], strides = [1, 1, 1]} : vector<1x8x128xf32> to vector<1x1x128xf32>
    %150 = vector.shape_cast %149 : vector<1x1x128xf32> to vector<1x128xf32>
    %151 = arith.maximumf %148, %150 : vector<1x128xf32>
    %152 = vector.extract_strided_slice %136 {offsets = [0, 6, 0], sizes = [1, 1, 128], strides = [1, 1, 1]} : vector<1x8x128xf32> to vector<1x1x128xf32>
    %153 = vector.shape_cast %152 : vector<1x1x128xf32> to vector<1x128xf32>
    %154 = vector.extract_strided_slice %136 {offsets = [0, 7, 0], sizes = [1, 1, 128], strides = [1, 1, 1]} : vector<1x8x128xf32> to vector<1x1x128xf32>
    %155 = vector.shape_cast %154 : vector<1x1x128xf32> to vector<1x128xf32>
    %156 = arith.maximumf %153, %155 : vector<1x128xf32>
    %157 = vector.extract_strided_slice %106 {offsets = [0, 4, 0, 0], sizes = [1, 1, 8, 128], strides = [1, 1, 1, 1]} : vector<1x8x8x128xf32> to vector<1x1x8x128xf32>
    %158 = vector.shape_cast %157 : vector<1x1x8x128xf32> to vector<1x8x128xf32>
    %159 = vector.extract_strided_slice %106 {offsets = [0, 5, 0, 0], sizes = [1, 1, 8, 128], strides = [1, 1, 1, 1]} : vector<1x8x8x128xf32> to vector<1x1x8x128xf32>
    %160 = vector.shape_cast %159 : vector<1x1x8x128xf32> to vector<1x8x128xf32>
    %161 = arith.maximumf %158, %160 : vector<1x8x128xf32>
    %162 = vector.extract_strided_slice %161 {offsets = [0, 0, 0], sizes = [1, 1, 128], strides = [1, 1, 1]} : vector<1x8x128xf32> to vector<1x1x128xf32>
    %163 = vector.shape_cast %162 : vector<1x1x128xf32> to vector<1x128xf32>
    %164 = vector.extract_strided_slice %161 {offsets = [0, 1, 0], sizes = [1, 1, 128], strides = [1, 1, 1]} : vector<1x8x128xf32> to vector<1x1x128xf32>
    %165 = vector.shape_cast %164 : vector<1x1x128xf32> to vector<1x128xf32>
    %166 = arith.maximumf %163, %165 : vector<1x128xf32>
    %167 = vector.extract_strided_slice %161 {offsets = [0, 2, 0], sizes = [1, 1, 128], strides = [1, 1, 1]} : vector<1x8x128xf32> to vector<1x1x128xf32>
    %168 = vector.shape_cast %167 : vector<1x1x128xf32> to vector<1x128xf32>
    %169 = vector.extract_strided_slice %161 {offsets = [0, 3, 0], sizes = [1, 1, 128], strides = [1, 1, 1]} : vector<1x8x128xf32> to vector<1x1x128xf32>
    %170 = vector.shape_cast %169 : vector<1x1x128xf32> to vector<1x128xf32>
    %171 = arith.maximumf %168, %170 : vector<1x128xf32>
    %172 = vector.extract_strided_slice %161 {offsets = [0, 4, 0], sizes = [1, 1, 128], strides = [1, 1, 1]} : vector<1x8x128xf32> to vector<1x1x128xf32>
    %173 = vector.shape_cast %172 : vector<1x1x128xf32> to vector<1x128xf32>
    %174 = vector.extract_strided_slice %161 {offsets = [0, 5, 0], sizes = [1, 1, 128], strides = [1, 1, 1]} : vector<1x8x128xf32> to vector<1x1x128xf32>
    %175 = vector.shape_cast %174 : vector<1x1x128xf32> to vector<1x128xf32>
    %176 = arith.maximumf %173, %175 : vector<1x128xf32>
    %177 = vector.extract_strided_slice %161 {offsets = [0, 6, 0], sizes = [1, 1, 128], strides = [1, 1, 1]} : vector<1x8x128xf32> to vector<1x1x128xf32>
    %178 = vector.shape_cast %177 : vector<1x1x128xf32> to vector<1x128xf32>
    %179 = vector.extract_strided_slice %161 {offsets = [0, 7, 0], sizes = [1, 1, 128], strides = [1, 1, 1]} : vector<1x8x128xf32> to vector<1x1x128xf32>
    %180 = vector.shape_cast %179 : vector<1x1x128xf32> to vector<1x128xf32>
    %181 = arith.maximumf %178, %180 : vector<1x128xf32>
    %182 = vector.extract_strided_slice %106 {offsets = [0, 6, 0, 0], sizes = [1, 1, 8, 128], strides = [1, 1, 1, 1]} : vector<1x8x8x128xf32> to vector<1x1x8x128xf32>
    %183 = vector.shape_cast %182 : vector<1x1x8x128xf32> to vector<1x8x128xf32>
    %184 = vector.extract_strided_slice %106 {offsets = [0, 7, 0, 0], sizes = [1, 1, 8, 128], strides = [1, 1, 1, 1]} : vector<1x8x8x128xf32> to vector<1x1x8x128xf32>
    %185 = vector.shape_cast %184 : vector<1x1x8x128xf32> to vector<1x8x128xf32>
    %186 = arith.maximumf %183, %185 : vector<1x8x128xf32>
    %187 = vector.extract_strided_slice %186 {offsets = [0, 0, 0], sizes = [1, 1, 128], strides = [1, 1, 1]} : vector<1x8x128xf32> to vector<1x1x128xf32>
    %188 = vector.shape_cast %187 : vector<1x1x128xf32> to vector<1x128xf32>
    %189 = vector.extract_strided_slice %186 {offsets = [0, 1, 0], sizes = [1, 1, 128], strides = [1, 1, 1]} : vector<1x8x128xf32> to vector<1x1x128xf32>
    %190 = vector.shape_cast %189 : vector<1x1x128xf32> to vector<1x128xf32>
    %191 = arith.maximumf %188, %190 : vector<1x128xf32>
    %192 = vector.extract_strided_slice %186 {offsets = [0, 2, 0], sizes = [1, 1, 128], strides = [1, 1, 1]} : vector<1x8x128xf32> to vector<1x1x128xf32>
    %193 = vector.shape_cast %192 : vector<1x1x128xf32> to vector<1x128xf32>
    %194 = vector.extract_strided_slice %186 {offsets = [0, 3, 0], sizes = [1, 1, 128], strides = [1, 1, 1]} : vector<1x8x128xf32> to vector<1x1x128xf32>
    %195 = vector.shape_cast %194 : vector<1x1x128xf32> to vector<1x128xf32>
    %196 = arith.maximumf %193, %195 : vector<1x128xf32>
    %197 = vector.extract_strided_slice %186 {offsets = [0, 4, 0], sizes = [1, 1, 128], strides = [1, 1, 1]} : vector<1x8x128xf32> to vector<1x1x128xf32>
    %198 = vector.shape_cast %197 : vector<1x1x128xf32> to vector<1x128xf32>
    %199 = vector.extract_strided_slice %186 {offsets = [0, 5, 0], sizes = [1, 1, 128], strides = [1, 1, 1]} : vector<1x8x128xf32> to vector<1x1x128xf32>
    %200 = vector.shape_cast %199 : vector<1x1x128xf32> to vector<1x128xf32>
    %201 = arith.maximumf %198, %200 : vector<1x128xf32>
    %202 = vector.extract_strided_slice %186 {offsets = [0, 6, 0], sizes = [1, 1, 128], strides = [1, 1, 1]} : vector<1x8x128xf32> to vector<1x1x128xf32>
    %203 = vector.shape_cast %202 : vector<1x1x128xf32> to vector<1x128xf32>
    %204 = vector.extract_strided_slice %186 {offsets = [0, 7, 0], sizes = [1, 1, 128], strides = [1, 1, 1]} : vector<1x8x128xf32> to vector<1x1x128xf32>
    %205 = vector.shape_cast %204 : vector<1x1x128xf32> to vector<1x128xf32>
    %206 = arith.maximumf %203, %205 : vector<1x128xf32>
    %207 = tpu.concatenate %116, %121, %126, %131, %141, %146, %151, %156, %166, %171, %176, %181, %191, %196, %201, %206 in 1 : vector<1x128xf32>, vector<1x128xf32>, vector<1x128xf32>, vector<1x128xf32>, vector<1x128xf32>, vector<1x128xf32>, vector<1x128xf32>, vector<1x128xf32>, vector<1x128xf32>, vector<1x128xf32>, vector<1x128xf32>, vector<1x128xf32>, vector<1x128xf32>, vector<1x128xf32>, vector<1x128xf32>, vector<1x128xf32> -> vector<1x2048xf32>
    %208 = arith.truncf %207 : vector<1x2048xf32> to vector<1x2048xbf16>
    %c0_97 = arith.constant 0 : index
    %c0_98 = arith.constant 0 : index
    %209 = vector.load %arg6[%c0_97, %c0_98] : memref<2048x128xbf16, #tpu.memory_space<vmem>>, vector<2048x128xbf16>
    %cst_99 = arith.constant dense<0.000000e+00> : vector<1x128xf32>
    %210 = tpu.matmul %208, %209, %cst_99 {dimension_numbers = #tpu.dot_dimension_numbers<[1], [0], [0], [1], [0, 0, 1, 1], [], []>} : vector<1x2048xbf16>, vector<2048x128xbf16>, vector<1x128xf32> -> vector<1x128xf32>
    %c0_100 = arith.constant 0 : index
    %c0_101 = arith.constant 0 : index
    %211 = vector.load %arg7[%c0_100, %c0_101] : memref<1x128xf32, #tpu.memory_space<vmem>>, vector<1x128xf32>
    %212 = arith.addf %210, %211 : vector<1x128xf32>
    %cst_102 = arith.constant 0.000000e+00 : f32
    %213 = vector.broadcast %cst_102 : f32 to vector<1x128xf32>
    %214 = arith.subf %213, %212 : vector<1x128xf32>
    %215 = math.exp %214 : vector<1x128xf32>
    %cst_103 = arith.constant 1.000000e+00 : f32
    %216 = vector.broadcast %cst_103 : f32 to vector<1x128xf32>
    %217 = arith.addf %216, %215 : vector<1x128xf32>
    %cst_104 = arith.constant 1.000000e+00 : f32
    %218 = vector.broadcast %cst_104 : f32 to vector<1x128xf32>
    %219 = arith.divf %218, %217 : vector<1x128xf32>
    %c0_105 = arith.constant 0 : index
    %c0_106 = arith.constant 0 : index
    %c0_107 = arith.constant 0 : index
    %220 = vector.load %arg8[%c0_105, %c0_106, %c0_107] : memref<1x1x128xf32, #tpu.memory_space<vmem>>, vector<1x1x128xf32>
    %221 = vector.shape_cast %220 : vector<1x1x128xf32> to vector<1x128xf32>
    %222 = vector.shape_cast %219 : vector<1x128xf32> to vector<1x1x128xf32>
    tpu.vector_store %arg8[%c0_105, %c0_106, %c0_107], %222 {strides = array<i32>} : memref<1x1x128xf32, #tpu.memory_space<vmem>>, vector<1x1x128xf32>,
    return
  }
  func.func @transform_0(%arg0: i32) -> (i32, i32, i32, i32) {
    %c0_i32 = arith.constant 0 : i32
    %c0_i32_0 = arith.constant 0 : i32
    %c0_i32_1 = arith.constant 0 : i32
    %c0_i32_2 = arith.constant 0 : i32
    return %c0_i32, %arg0, %c0_i32_0, %c0_i32_1 : i32, i32, i32, i32
  }
  func.func @transform_1(%arg0: i32) -> (i32, i32) {
    %c0_i32 = arith.constant 0 : i32
    %c0_i32_0 = arith.constant 0 : i32
    %c0_i32_1 = arith.constant 0 : i32
    return %c0_i32, %c0_i32_0 : i32, i32
  }
  func.func @transform_2(%arg0: i32) -> (i32, i32) {
    %c0_i32 = arith.constant 0 : i32
    %c0_i32_0 = arith.constant 0 : i32
    %c0_i32_1 = arith.constant 0 : i32
    return %c0_i32, %c0_i32_0 : i32, i32
  }
  func.func @transform_3(%arg0: i32) -> (i32, i32, i32) {
    %c0_i32 = arith.constant 0 : i32
    %c0_i32_0 = arith.constant 0 : i32
    %c0_i32_1 = arith.constant 0 : i32
    %c0_i32_2 = arith.constant 0 : i32
    return %c0_i32, %c0_i32_0, %c0_i32_1 : i32, i32, i32
  }
  func.func @transform_4(%arg0: i32) -> (i32, i32) {
    %c0_i32 = arith.constant 0 : i32
    %c0_i32_0 = arith.constant 0 : i32
    %c0_i32_1 = arith.constant 0 : i32
    return %c0_i32, %c0_i32_0 : i32, i32
  }
  func.func @transform_5(%arg0: i32) -> (i32, i32) {
    %c0_i32 = arith.constant 0 : i32
    %c0_i32_0 = arith.constant 0 : i32
    %c0_i32_1 = arith.constant 0 : i32
    return %c0_i32, %c0_i32_0 : i32, i32
  }
  func.func @transform_6(%arg0: i32) -> (i32, i32) {
    %c0_i32 = arith.constant 0 : i32
    %c0_i32_0 = arith.constant 0 : i32
    %c0_i32_1 = arith.constant 0 : i32
    return %c0_i32, %c0_i32_0 : i32, i32
  }
  func.func @transform_7(%arg0: i32) -> (i32, i32, i32) {
    %c0_i32 = arith.constant 0 : i32
    %c0_i32_0 = arith.constant 0 : i32
    %c0_i32_1 = arith.constant 0 : i32
    return %arg0, %c0_i32, %c0_i32_0 : i32, i32, i32
  }
}

</mosaic_0001>

<bundles_post_ra>
// kernel: model_forward.1
= control target key start
LH: loop header
LB: loop body
LE: loop exit
PB: predicated region body
PF: predicated region fallthrough
CT: control target
= control target key end

     0   :  { %12 = vsyncpa [#allocation5], 0  ;;  %s6129_s0 = inlined_call_operand.vmem [shape: bf16[4,2,64,36], index: 0, kind: input, shape index: {}]   ;;  %s6130_s1 = inlined_call_operand.vmem [shape: bf16[36,128], index: 1, kind: input, shape index: {}]   ;;  %s6131_s2 = inlined_call_operand.vmem [shape: f32[1,128], index: 2, kind: input, shape index: {}]   ;;  %s6132_s3 = inlined_call_operand.vmem [shape: bf16[9,128,128], index: 3, kind: input, shape index: {}]   ;;  %s6133_s4 = inlined_call_operand.vmem [shape: f32[1,128], index: 4, kind: input, shape index: {}]   ;;  %s6134_s5 = inlined_call_operand.vmem [shape: bf16[2048,128], index: 5, kind: input, shape index: {}]   ;;  %s6135_s6 = inlined_call_operand.vmem [shape: f32[1,128], index: 6, kind: input, shape index: {}]   ;;  %s6136_s7 = inlined_call_operand.hbm [shape: f32[2,1,128], index: 7, kind: output, shape index: {}]  }
   0x1   :  { %14 = vsyncpa [#allocation5 + $0x1], 0  ;;  %s5101_s24 = smov 0   ;;  %s5103_s25 = smov 0  }
   0x2   :  { %s5105_s26 = smov 0   ;;  %s5107_s27 = smov 0  }
   0x3 LB: > { %s3732_s28 = sadd.s32 4294967295, %s5057_s27   ;;  %s3733_s29 = sadd.s32 4294967294, %s5057_s27   ;;  %s5057_s27 = sphi %s5107_s27, %s6142_s27   ;;  %s5053_s26 = sphi %s5105_s26, %s6141_s26   ;;  %s5049_s25 = sphi %s5103_s25, %s6140_s25   ;;  %s5045_s24 = sphi %s5101_s24, %s6139_s24  }
   0x4   : > { %s5124_s30 = sadd.s32 1, %s5057_s27   ;;  %s27_s8 = sadd.s32 1, %s5053_s26 }
   0x5   : > { %s24_s9 = ssub.s32 %s5057_s27, %s5124_s30  ;;  %p34_p0 = scmp.ne.s32.totalorder %s5053_s26, %s5049_s25 }
   0x6   : > { %p25_p1 = scmp.eq.s32.totalorder %s24_s9, 0  ;;  %p35_p2 = scmp.eq.s32.totalorder %s5057_s27, 0 }
   0x7   : > { %p190_p3 = scmp.eq.s32.totalorder %s3732_s28, 1  ;;  %p195_p4 = scmp.ne.s32.totalorder %s5049_s25, %s5045_s24 }
   0x8   : > { %s5137_s10 = scalar_select %p25_p1, %s5053_s26, %s27_s8  }
   0x9   : > { %p36_p5 = por %p35_p2, %p34_p0  ;;  %p5139_p6 = por %p190_p3, %p34_p0 }
   0xa   : > { %p196_p7 = scmp.eq.s32.totalorder %s3733_s29, 1  ;;  %p3735_p9 = scmp.ge.s32.totalorder %s5057_s27, 2 }
   0xc   : > { %p5143_p8 = por %p196_p7, %p195_p4  ;;  %230 = sbr.rel (%p3735_p9) target bundleno = 31 (0x1f), region = 40 }
  0x13   : > { %233 = sbr.rel (!%p36_p5) target bundleno = 31 (0x1f), region = 44  ;;  %s235_s13 = sand.u32 (%p36_p5), 1, %s5053_s26  }
  0x14   : > { %s4109_s14 = sshll.u32 (%p36_p5), %s5057_s27, 5  ;;  %s3736_s15 = sshll.u32 (%p36_p5), %s235_s13, 7 }
  0x15   : > { %s5155_s18 = scalar_lea.vmem (%p36_p5), %s6129_s0, %s4109_s14  ;;  %s237_s19 = scalar_lea.vmem (%p36_p5), [#allocation3], %s3736_s15 }
  0x16   : > { %v256_v0 = vld [vmem:[%s5155_s18] sm:$0xff] (%p36_p5)   ;;  %v260_v1 = vld [vmem:[%s5155_s18 + $0x8] sm:$0xff] (%p36_p5)   ;;  %v264_v2 = vld [vmem:[%s5155_s18 + $0x10] sm:$0xff] (%p36_p5)  }
  0x17   : > { %257 = vst [vmem:[%s237_s19] sm:$0xff] (%p36_p5), %v256_v0   ;;  %261 = vst [vmem:[%s237_s19 + $0x8] sm:$0xff] (%p36_p5), %v260_v1   ;;  %v268_v3 = vld [vmem:[%s5155_s18 + $0x18] sm:$0xff] (%p36_p5)   ;;  %v272_v4 = vld [vmem:[%s5155_s18 + $0x40] sm:$0xff] (%p36_p5)  }
  0x18   : > { %265 = vst [vmem:[%s237_s19 + $0x10] sm:$0xff] (%p36_p5), %v264_v2   ;;  %v276_v5 = vld [vmem:[%s5155_s18 + $0x48] sm:$0xff] (%p36_p5)   ;;  %269 = vst [vmem:[%s237_s19 + $0x18] sm:$0xff] (%p36_p5), %v268_v3   ;;  %v280_v6 = vld [vmem:[%s5155_s18 + $0x50] sm:$0xff] (%p36_p5)  }
  0x19   : > { %273 = vst [vmem:[%s237_s19 + $0x20] sm:$0xff] (%p36_p5), %v272_v4   ;;  %277 = vst [vmem:[%s237_s19 + $0x28] sm:$0xff] (%p36_p5), %v276_v5   ;;  %v284_v7 = vld [vmem:[%s5155_s18 + $0x58] sm:$0xff] (%p36_p5)   ;;  %v288_v8 = vld [vmem:[%s5155_s18 + $0x80] sm:$0xff] (%p36_p5)  }
  0x1a   : > { %281 = vst [vmem:[%s237_s19 + $0x30] sm:$0xff] %v280_v6   ;;  %285 = vst [vmem:[%s237_s19 + $0x38] sm:$0xff] %v284_v7   ;;  %v292_v9 = vld [vmem:[%s5155_s18 + $0x88] sm:$0xff]   ;;  %v296_v10 = vld [vmem:[%s5155_s18 + $0x90] sm:$0xff]  }
  0x1b   : > { %289 = vst [vmem:[%s237_s19 + $0x40] sm:$0xff] %v288_v8   ;;  %v300_v11 = vld [vmem:[%s5155_s18 + $0x98] sm:$0xff]   ;;  %293 = vst [vmem:[%s237_s19 + $0x48] sm:$0xff] %v292_v9   ;;  %v304_v12 = vld [vmem:[%s5155_s18 + $0xc0] sm:$0xff]  }
  0x1c   : > { %297 = vst [vmem:[%s237_s19 + $0x50] sm:$0xff] %v296_v10   ;;  %301 = vst [vmem:[%s237_s19 + $0x58] sm:$0xff] %v300_v11   ;;  %v308_v13 = vld [vmem:[%s5155_s18 + $0xc8] sm:$0xff]   ;;  %v312_v14 = vld [vmem:[%s5155_s18 + $0xd0] sm:$0xff]  }
  0x1d   : > { %305 = vst [vmem:[%s237_s19 + $0x60] sm:$0xff] %v304_v12   ;;  %309 = vst [vmem:[%s237_s19 + $0x68] sm:$0xff] %v308_v13   ;;  %v316_v15 = vld [vmem:[%s5155_s18 + $0xd8] sm:$0xff]  }
  0x1e   : > { %313 = vst [vmem:[%s237_s19 + $0x70] sm:$0xff] %v312_v14   ;;  %317 = vst [vmem:[%s237_s19 + $0x78] sm:$0xff] %v316_v15  }
  0x1f PF: > { %p3739_p10 = scmp.ge.s32.totalorder %s5057_s27, 1  ;;  %p405_p11 = scmp.lt.s32.totalorder %s5057_s27, 3 }
  0x21   : > { %p406_p12 = pnand %p3739_p10, %p405_p11 }
  0x22   : > { %v4772_v16 = vld [vmem:[%s6130_s1] sm:$0xff] (!%p406_p12)   ;;  %v4773_v17 = vld [vmem:[%s6130_s1 + $0x8] sm:$0xff] (!%p406_p12)   ;;  %s5182_s29 = sand.u32 (!%p406_p12), 1, %s5049_s25   ;;  %v4774_v18 = vld [vmem:[%s6130_s1 + $0x10] ss:$0 sps:$4 sm:$0x33] (!%p406_p12)  }
  0x23   : > { %409 = sbr.rel (%p406_p12) target bundleno = 1289 (0x509), region = 85  ;;  %4413 = vmatprep.subr.bf16.mxu0 (!%p406_p12), %v4772_v16  ;;  %s3740_s13 = sshll.u32 (!%p406_p12), %s5182_s29, 7  ;;  %vm582_vm0 = vcmask (!%p406_p12), 293888   ;;  %vm631_vm1 = vcmask (!%p406_p12), 1041408   ;;  %v4791_v36 = vld [vmem:[%s6132_s3 + $0x40] sm:$0xff] (!%p406_p12)   ;;  %v4792_v37 = vld [vmem:[%s6132_s3 + $0x48] sm:$0xff] (!%p406_p12)  }
  0x24   : > { %4414 = vmatpush3.bf16.msra.mxu0 (!%p406_p12), %v4772_v16  ;;  %s5188_s14 = scalar_lea.vmem (!%p406_p12), [#allocation3], %s3740_s13  ;;  %v633_v20 = vsel (!%p406_p12), %vm631_vm1, %v4774_v18, 0  ;;  %4451 = vmatprep.subr.bf16.mxu1 (!%p406_p12), %v4791_v36  ;;  %v4793_v38 = vld [vmem:[%s6132_s3 + $0x50] sm:$0xff] (!%p406_p12)   ;;  %v4794_v39 = vld [vmem:[%s6132_s3 + $0x58] sm:$0xff] (!%p406_p12)   ;;  %v4795_v40 = vld [vmem:[%s6132_s3 + $0x60] sm:$0xff] (!%p406_p12)   ;;  %v5059_v42 = vmov (!%p406_p12), 0.0  }
  0x25   : > { %4415 = vmatprep.subr.bf16.mxu0 (!%p406_p12), %v4773_v17  ;;  %v4775_v19 = vld [vmem:[%s5188_s14] sm:$0xff] (!%p406_p12)   ;;  %v4776_v21 = vld [vmem:[%s5188_s14 + $0x8] sm:$0xff] (!%p406_p12)   ;;  %v4777_v22 = vld [vmem:[%s5188_s14 + $0x10] sm:$0xff] (!%p406_p12)   ;;  %4452 = vmatpush3.bf16.msra.mxu1 (!%p406_p12), %v4791_v36  ;;  %852 = vst [vmem:[#allocation2] sm:$0xff] (!%p406_p12), %v5059_v42  ;;  %s4106_s18 = sshll.u32 (!%p406_p12), %s3732_s28, 4  ;;  %s441_s19 = scalar_lea.vmem (!%p406_p12), [#allocation4], %s5182_s29 }
  0x26   : > { %4419 = vmatprep.mubr.msk.bf16.mxu0 (!%p406_p12), %vm582_vm0, %v4775_v19  ;;  %v4778_v23 = vld [vmem:[%s5188_s14 + $0x18] sm:$0xff] (!%p406_p12)   ;;  %v4779_v24 = vld [vmem:[%s5188_s14 + $0x20] sm:$0xff] (!%p406_p12)   ;;  %v4780_v25 = vld [vmem:[%s5188_s14 + $0x28] sm:$0xff] (!%p406_p12)   ;;  %4453 = vmatprep.subr.bf16.mxu1 (!%p406_p12), %v4792_v37  ;;  %853 = vst [vmem:[#allocation2 + $0x8] sm:$0x3] (!%p406_p12), %v5059_v42  ;;  %s3672_s20 = sshll.u32 (!%p406_p12), %s441_s19, 4  ;;  %s6085_s23 = scalar_lea.hbm (!%p406_p12), %s6136_s7, %s4106_s18  ;;  %s6087_s20 = int_to_ptr.vmem [resolvable:$true] %s3672_s20 }
  0x27   : > { %v4781_v26 = vld [vmem:[%s5188_s14 + $0x30] sm:$0xff] (!%p406_p12)   ;;  %v4782_v27 = vld [vmem:[%s5188_s14 + $0x38] sm:$0xff] (!%p406_p12)   ;;  %v4783_v28 = vld [vmem:[%s5188_s14 + $0x40] sm:$0xff] (!%p406_p12)   ;;  %855 = vst [vmem:[#allocation2 + $0x90] sm:$0xff] (!%p406_p12), %v5059_v42  ;;  %s3660_s8 = scalar_lea.sflag (!%p406_p12), [#allocation5], %s5182_s29  ;;  %s4995_s9 = scalar_lea.vmem (!%p406_p12), %s6087_s20, 16 }
  0x28   : > { %4416 = vmatpush3.bf16.msra.mxu0 (!%p406_p12), %v4773_v17  ;;  %v4784_v29 = vld [vmem:[%s5188_s14 + $0x48] sm:$0xff] (!%p406_p12)   ;;  %v4785_v30 = vld [vmem:[%s5188_s14 + $0x50] sm:$0xff] (!%p406_p12)   ;;  %v4786_v31 = vld [vmem:[%s5188_s14 + $0x58] sm:$0xff] (!%p406_p12)   ;;  %856 = vst [vmem:[#allocation2 + $0x98] sm:$0x3] (!%p406_p12), %v5059_v42  ;;  %p4996_p13 = scmp.ne.s32.totalorder (!%p406_p12), %s6087_s20, %s4995_s9  ;;  %s5060_s28 = smov (!%p406_p12), [#allocation4]  }
  0x29   : > { %4731 = vmatprep.subr.msk.bf16.mxu0 (!%p406_p12), %vm631_vm1, %v4774_v18  ;;  %v4787_v32 = vld [vmem:[%s5188_s14 + $0x60] sm:$0xff] (!%p406_p12)   ;;  %v4788_v33 = vld [vmem:[%s5188_s14 + $0x68] sm:$0xff] (!%p406_p12)   ;;  %v4789_v34 = vld [vmem:[%s5188_s14 + $0x70] sm:$0xff] (!%p406_p12)   ;;  %4454 = vmatpush3.bf16.msra.mxu1 (!%p406_p12), %v4792_v37  ;;  %858 = vst [vmem:[#allocation2 + $0x10] sm:$0x1] (!%p406_p12), %v5059_v42  ;;  %s4999_s13 = sshll.u32 (!%p406_p12), %s5060_s28, 4  ;;  %s5000_s13 = int_to_ptr.vmem [resolvable:$false] %s4999_s13 }
  0x2a   : > { %v4790_v35 = vld [vmem:[%s5188_s14 + $0x78] sm:$0xff]   ;;  %4455 = vmatprep.subr.bf16.mxu1 %v4793_v38  ;;  %v4796_v41 = vld [vmem:[%s6132_s3 + $0x68] sm:$0xff]   ;;  %859 = vst [vmem:[#allocation2 + $0x20] sm:$0x1] %v5059_v42  ;;  %860 = vst [vmem:[#allocation2 + $0x30] sm:$0x1] %v5059_v42  ;;  %p4997_p0 = pnand %p4996_p13, %p5139_p6  ;;  %p5002_p2 = scmp.lt.s32.totalorder %s6087_s20, %s5000_s13 }
  0x2b   : > { %861 = vst [vmem:[#allocation2 + $0x40] sm:$0x1] %v5059_v42  ;;  %862 = vst [vmem:[#allocation2 + $0x50] sm:$0x1] %v5059_v42  ;;  %v4797_v43 = vld [vmem:[%s6132_s3 + $0x70] sm:$0xff]   ;;  %v4798_v44 = vld [vmem:[%s6132_s3 + $0x78] sm:$0xff]  }
  0x2c   : > { %4418 = vmatpush3.bf16.msra.mxu0 %v633_v20  ;;  %863 = vst [vmem:[#allocation2 + $0x60] sm:$0x1] %v5059_v42  ;;  %864 = vst [vmem:[#allocation2 + $0x70] sm:$0x1] %v5059_v42  ;;  %v5249_v45 = vld [vmem:[%s6132_s3] sm:$0xff]   ;;  %p4998_p1 = pneg %p4997_p0  ;;  %s5001_s14 = scalar_lea.vmem %s5000_s13, 32 }
  0x2d   : > { %4456 = vmatpush3.bf16.msra.mxu1 %v4793_v38  ;;  %865 = vst [vmem:[#allocation2 + $0x80] sm:$0x1] %v5059_v42  ;;  %868 = vst [vmem:[#allocation2 + $0x19] sm:$0x1] %v5059_v42  ;;  %v5255_v54 = vld [vmem:[%s6131_s2] ss:$0 sm:$0xff]  ;;  %p5003_p3 = scmp.lt.s32.totalorder %s5001_s14, %s4995_s9 }
  0x2e   : > { %4457 = vmatprep.subr.bf16.mxu1 %v4794_v39  ;;  %869 = vst [vmem:[#allocation2 + $0x29] sm:$0x1] %v5059_v42  ;;  %870 = vst [vmem:[#allocation2 + $0x39] sm:$0x1] %v5059_v42 }
  0x2f   : > { %4420 = vmatmul.mubr.msk.bf16.vlgmr.msra.gmra.mrb[0].mxu0 %vm582_vm0, %v4776_v21  ;;  %871 = vst [vmem:[#allocation2 + $0x49] sm:$0x1] %v5059_v42  ;;  %872 = vst [vmem:[#allocation2 + $0x59] sm:$0x1] %v5059_v42  ;;  %p5004_p4 = por %p5003_p3, %p5002_p2 }
  0x30   : > { %4423 = vmatprep.mubr.msk.bf16.mxu0 %vm582_vm0, %v4777_v22  ;;  %873 = vst [vmem:[#allocation2 + $0x69] sm:$0x1] %v5059_v42  ;;  %874 = vst [vmem:[#allocation2 + $0x79] sm:$0x1] %v5059_v42 }
  0x31   : > { %4458 = vmatpush3.bf16.msra.mxu1 %v4794_v39  ;;  %875 = vst [vmem:[#allocation2 + $0x89] sm:$0x1] %v5059_v42  ;;  %867 = vst [vmem:[#allocation2 + $0x9] sm:$0x1] %v5059_v42  ;;  %p5005_p5 = pnand %p5004_p4, %p4998_p1 }
  0x32   : > { %4459 = vmatprep.subr.bf16.mxu1 %v4795_v40  ;;  %857 = vst [vmem:[#allocation2] sm:$0x1] %v5059_v42  ;;  %866 = vst [vmem:[#allocation2 + $0x90] sm:$0x1] %v5059_v42 }
  0x33   : > { %876 = vst [vmem:[#allocation2 + $0x99] sm:$0x1] %v5059_v42 }
  0x35   : > { %4460 = vmatpush3.bf16.msra.mxu1 %v4795_v40 }
  0x36   : > { %4461 = vmatprep.subr.bf16.mxu1 %v4796_v41 }
  0x37   : > { %4424 = vmatmul.mubr.msk.bf16.gmra.mrb[4].mxu0 %vm582_vm0, %v4778_v23 }
  0x38   : > { %4427 = vmatprep.mubr.msk.bf16.mxu0 %vm582_vm0, %v4779_v24 }
  0x39   : > { %4462 = vmatpush3.bf16.msra.mxu1 %v4796_v41 }
  0x3a   : > { %4463 = vmatprep.subr.bf16.mxu1 %v4797_v43 }
  0x3d   : > { %4464 = vmatpush3.bf16.msra.mxu1 %v4797_v43 }
  0x3e   : > { %4465 = vmatprep.subr.bf16.mxu1 %v4798_v44 }
  0x3f   : > { %4428 = vmatmul.mubr.msk.bf16.gmra.mrb[8].mxu0 %vm582_vm0, %v4780_v25 }
  0x40   : > { %4431 = vmatprep.mubr.msk.bf16.mxu0 %vm582_vm0, %v4781_v26 }
  0x41   : > { %4466 = vmatpush3.bf16.msra.mxu1 %v4798_v44 }
  0x42   : > { %4475 = vmatprep.subr.bf16.mxu1 %v5249_v45 }
  0x47   : > { %4432 = vmatmul.mubr.msk.bf16.gmra.mrb[12].mxu0 %vm582_vm0, %v4782_v27 }
  0x48   : > { %4435 = vmatprep.mubr.msk.bf16.mxu0 %vm582_vm0, %v4783_v28 }
  0x4f   : > { %4436 = vmatmul.mubr.msk.bf16.gmra.mrb[16].mxu0 %vm582_vm0, %v4784_v29 }
  0x50   : > { %4439 = vmatprep.mubr.msk.bf16.mxu0 %vm582_vm0, %v4785_v30 }
  0x57   : > { %4440 = vmatmul.mubr.msk.bf16.gmra.mrb[20].mxu0 %vm582_vm0, %v4786_v31 }
  0x58   : > { %4443 = vmatprep.mubr.msk.bf16.mxu0 %vm582_vm0, %v4787_v32 }
  0x5f   : > { %4444 = vmatmul.mubr.msk.bf16.gmra.mrb[24].mxu0 %vm582_vm0, %v4788_v33 }
  0x60   : > { %4447 = vmatprep.mubr.msk.bf16.mxu0 %vm582_vm0, %v4789_v34 }
  0x67   : > { %4448 = vmatmul.mubr.msk.bf16.gmra.mrb[28].mxu0 %vm582_vm0, %v4790_v35 }
 0x102   : > { %v4421_v46 = vpop.f32.mrb[0].mxu0 }
 0x103   : > { %v669_v47 = vpop.f32.mrb[1].mxu0  ;;  %v678_v55 = vadd.f32 %v4421_v46, %v5255_v54 }
 0x104   : > { %v4422_v48 = vpop.f32.mrb[2].mxu0  ;;  %v670_v56 = vadd.f32 %v5255_v54, %v669_v47 }
 0x105   : > { %v672_v49 = vpop.f32.mrb[3].mxu0  ;;  %v681_v58 = vadd.f32 %v4422_v48, %v5255_v54  ;;  %v798_v0 = vmax.f32 %v678_v55, 0.0 }
 0x106   : > { %v673_v61 = vadd.f32 %v5255_v54, %v672_v49  ;;  %v796_v4 = vmax.f32 %v670_v56, 0.0 }
 0x107   : > { %v799_v7 = vmax.f32 %v681_v58, 0.0 }
 0x108   : > { %v797_v10 = vmax.f32 %v673_v61, 0.0 }
 0x10a   : > { %v4425_v50 = vpop.f32.mrb[4].mxu0 }
 0x10b   : > { %v685_v51 = vpop.f32.mrb[5].mxu0  ;;  %v694_v13 = vadd.f32 %v4425_v50, %v5255_v54 }
 0x10c   : > { %v4426_v52 = vpop.f32.mrb[6].mxu0  ;;  %v686_v15 = vadd.f32 %v5255_v54, %v685_v51 }
 0x10d   : > { %v688_v53 = vpop.f32.mrb[7].mxu0  ;;  %v697_v18 = vadd.f32 %v4426_v52, %v5255_v54  ;;  %v802_v24 = vmax.f32 %v694_v13, 0.0  ;;  %v914_v13 = vld [vmem:[#allocation2 + $0x1] sm:$0xff] }
 0x10e   : > { %v689_v21 = vadd.f32 %v5255_v54, %v688_v53  ;;  %v800_v28 = vmax.f32 %v686_v15, 0.0 }
 0x10f   : > { %v803_v31 = vmax.f32 %v697_v18, 0.0 }
 0x110   : > { %v801_v34 = vmax.f32 %v689_v21, 0.0 }
 0x112   : > { %v4429_v57 = vpop.f32.mrb[8].mxu0 }
 0x113   : > { %v710_v59 = vadd.f32 %v4429_v57, %v5255_v54  ;;  %v701_v60 = vpop.f32.mrb[9].mxu0 }
 0x114   : > { %v702_v62 = vadd.f32 %v5255_v54, %v701_v60  ;;  %v4430_v63 = vpop.f32.mrb[10].mxu0 }
 0x115   : > { %v806_v1 = vmax.f32 %v710_v59, 0.0  ;;  %v713_v2 = vadd.f32 %v4430_v63, %v5255_v54  ;;  %v704_v3 = vpop.f32.mrb[11].mxu0 }
 0x116   : > { %v804_v5 = vmax.f32 %v702_v62, 0.0  ;;  %v705_v6 = vadd.f32 %v5255_v54, %v704_v3 }
 0x117   : > { %v5265_v8 = vmax.f32 %v798_v0, %v806_v1  ;;  %v807_v9 = vmax.f32 %v713_v2, 0.0 }
 0x118   : > { %v5267_v11 = vmax.f32 %v796_v4, %v804_v5  ;;  %v805_v12 = vmax.f32 %v705_v6, 0.0 }
 0x119   : > { %v5270_v14 = vmax.f32 %v799_v7, %v807_v9 }
 0x11a   : > { %v5273_v16 = vmax.f32 %v797_v10, %v805_v12  ;;  %v4433_v17 = vpop.f32.mrb[12].mxu0 }
 0x11b   : > { %v726_v19 = vadd.f32 %v4433_v17, %v5255_v54  ;;  %v717_v20 = vpop.f32.mrb[13].mxu0 }
 0x11c   : > { %v718_v22 = vadd.f32 %v5255_v54, %v717_v20  ;;  %v4434_v23 = vpop.f32.mrb[14].mxu0 }
 0x11d   : > { %v810_v25 = vmax.f32 %v726_v19, 0.0  ;;  %v729_v26 = vadd.f32 %v4434_v23, %v5255_v54  ;;  %v720_v27 = vpop.f32.mrb[15].mxu0 }
 0x11e   : > { %v808_v29 = vmax.f32 %v718_v22, 0.0  ;;  %v721_v30 = vadd.f32 %v5255_v54, %v720_v27 }
 0x11f   : > { %v5281_v32 = vmax.f32 %v802_v24, %v810_v25  ;;  %v811_v33 = vmax.f32 %v729_v26, 0.0 }
 0x120   : > { %v5283_v35 = vmax.f32 %v800_v28, %v808_v29  ;;  %v809_v36 = vmax.f32 %v721_v30, 0.0 }
 0x121   : > { %v5285_v37 = vmax.f32 %v803_v31, %v811_v33 }
 0x122   : > { %v5287_v38 = vmax.f32 %v801_v34, %v809_v36  ;;  %v4437_v39 = vpop.f32.mrb[16].mxu0  ;;  %v4800_v34 = vld [vmem:[%s6132_s3 + $0x8] sm:$0xff]  }
 0x123   : > { %v733_v40 = vpop.f32.mrb[17].mxu0  ;;  %v742_v48 = vadd.f32 %v4437_v39, %v5255_v54 }
 0x124   : > { %v4438_v41 = vpop.f32.mrb[18].mxu0  ;;  %v734_v49 = vadd.f32 %v5255_v54, %v733_v40 }
 0x125   : > { %v736_v42 = vpop.f32.mrb[19].mxu0  ;;  %v745_v51 = vadd.f32 %v4438_v41, %v5255_v54  ;;  %v814_v58 = vmax.f32 %v742_v48, 0.0 }
 0x126   : > { %v737_v55 = vadd.f32 %v5255_v54, %v736_v42  ;;  %v812_v62 = vmax.f32 %v734_v49, 0.0  ;;  %v4801_v49 = vld [vmem:[%s6132_s3 + $0x10] sm:$0xff]  }
 0x127   : > { %v815_v1 = vmax.f32 %v745_v51, 0.0  ;;  %v886_v51 = vld [vmem:[#allocation2] sm:$0xff] }
 0x128   : > { %v813_v5 = vmax.f32 %v737_v55, 0.0 }
 0x12a   : > { %v4441_v43 = vpop.f32.mrb[20].mxu0 }
 0x12b   : > { %v749_v44 = vpop.f32.mrb[21].mxu0  ;;  %v758_v2 = vadd.f32 %v4441_v43, %v5255_v54 }
 0x12c   : > { %v4442_v46 = vpop.f32.mrb[22].mxu0  ;;  %v750_v9 = vadd.f32 %v5255_v54, %v749_v44 }
 0x12d   : > { %v752_v47 = vpop.f32.mrb[23].mxu0  ;;  %v818_v19 = vmax.f32 %v758_v2, 0.0  ;;  %v761_v20 = vadd.f32 %v4442_v46, %v5255_v54 }
 0x12e   : > { %v816_v27 = vmax.f32 %v750_v9, 0.0 }
 0x12f   : > { %v819_v39 = vmax.f32 %v761_v20, 0.0 }
 0x132   : > { %v4445_v50 = vpop.f32.mrb[24].mxu0 }
 0x133   : > { %v774_v52 = vadd.f32 %v4445_v50, %v5255_v54  ;;  %v765_v53 = vpop.f32.mrb[25].mxu0 }
 0x134   : > { %v766_v56 = vadd.f32 %v5255_v54, %v765_v53  ;;  %v4446_v57 = vpop.f32.mrb[26].mxu0 }
 0x135   : > { %v822_v59 = vmax.f32 %v774_v52, 0.0  ;;  %v777_v60 = vadd.f32 %v4446_v57, %v5255_v54  ;;  %v768_v61 = vpop.f32.mrb[27].mxu0  ;;  %v4802_v57 = vld [vmem:[%s6132_s3 + $0x18] sm:$0xff]  }
 0x136   : > { %v820_v63 = vmax.f32 %v766_v56, 0.0  ;;  %v769_v0 = vadd.f32 %v5255_v54, %v768_v61 }
 0x137   : > { %v838_v3 = vmax.f32 %v814_v58, %v822_v59  ;;  %v823_v4 = vmax.f32 %v777_v60, 0.0 }
 0x138   : > { %v836_v6 = vmax.f32 %v812_v62, %v820_v63  ;;  %v821_v7 = vmax.f32 %v769_v0, 0.0  ;;  %v4803_v62 = vld [vmem:[%s6132_s3 + $0x20] sm:$0xff]  }
 0x139   : > { %v5300_v10 = vmax.f32 %v5265_v8, %v838_v3  ;;  %v839_v12 = vmax.f32 %v815_v1, %v823_v4  ;;  %v753_v8 = vadd.f32 %v5255_v54, %v752_v47  ;;  %v4804_v1 = vld [vmem:[%s6132_s3 + $0x28] sm:$0xff]   ;;  %v4805_v3 = vld [vmem:[%s6132_s3 + $0x30] sm:$0xff]   ;;  %v4806_v4 = vld [vmem:[%s6132_s3 + $0x38] sm:$0xff]  }
 0x13a   : > { %v5303_v15 = vmax.f32 %v5267_v11, %v836_v6  ;;  %v837_v17 = vmax.f32 %v813_v5, %v821_v7  ;;  %v4449_v18 = vpop.f32.mrb[28].mxu0  ;;  %v4807_v5 = vld [vmem:[%s6132_s3 + $0x80] sm:$0xff]  }
 0x13b   : > { %880 = vst [vmem:[#allocation2 + $0x31] sm:$0xff] %v5300_v10  ;;  %v5308_v21 = vmax.f32 %v5270_v14, %v839_v12  ;;  %v790_v22 = vadd.f32 %v4449_v18, %v5255_v54  ;;  %v781_v23 = vpop.f32.mrb[29].mxu0  ;;  %v817_v42 = vmax.f32 %v753_v8, 0.0 }
 0x13c   : > { %878 = vst [vmem:[#allocation2 + $0x11] sm:$0xff] %v5303_v15  ;;  %v5314_v11 = vmax.f32 %v5273_v16, %v837_v17  ;;  %v782_v24 = vadd.f32 %v5255_v54, %v781_v23  ;;  %v4450_v25 = vpop.f32.mrb[30].mxu0  ;;  %v922_v26 = vpack.c.bf16 %v5303_v15, %v914_v13  ;;  %v4808_v17 = vld [vmem:[%s6132_s3 + $0x88] sm:$0xff]  }
 0x13d   : > { %881 = vst [vmem:[#allocation2 + $0x41] sm:$0xff] %v5308_v21  ;;  %v826_v14 = vmax.f32 %v790_v22, 0.0  ;;  %v793_v28 = vadd.f32 %v4450_v25, %v5255_v54  ;;  %v784_v29 = vpop.f32.mrb[31].mxu0  ;;  %v1478_v30 = vpack.c.bf16 %v5308_v21, %v5300_v10  ;;  %v1169_v22 = vld [vmem:[#allocation2 + $0x2] sm:$0xff] }
 0x13e   : > { %879 = vst [vmem:[#allocation2 + $0x21] sm:$0xff] %v5314_v11  ;;  %v824_v31 = vmax.f32 %v782_v24, 0.0  ;;  %v785_v16 = vadd.f32 %v5255_v54, %v784_v29  ;;  %4467 = vmatprep.mubr.bf16.mxu1 %v922_v26  ;;  %v5326_v33 = vpack.c.bf16 %v5300_v10, %v5314_v11  ;;  %v1477_v36 = vpack.c.bf16 %v5314_v11, %v5303_v15  ;;  %v4810_v24 = vld [vmem:[%s6132_s3 + $0x98] sm:$0xff]   ;;  %v4811_v26 = vld [vmem:[%s6132_s3 + $0xa0] sm:$0xff]  }
 0x13f   : > { %v842_v40 = vmax.f32 %v818_v19, %v826_v14  ;;  %v827_v41 = vmax.f32 %v793_v28, 0.0  ;;  %v4809_v19 = vld [vmem:[%s6132_s3 + $0x90] sm:$0xff]   ;;  %v4814_v28 = vld [vmem:[%s6132_s3 + $0xb8] sm:$0xff]   ;;  %v4815_v29 = vld [vmem:[%s6132_s3 + $0xc0] sm:$0xff]  }
 0x140   : > { %v840_v43 = vmax.f32 %v816_v27, %v824_v31  ;;  %v825_v44 = vmax.f32 %v785_v16, 0.0  ;;  %4468 = vmatmul.mubr.bf16.vlgmr.msra.gmra.mrb[0].mxu1 %v5326_v33  ;;  %v4812_v27 = vld [vmem:[%s6132_s3 + $0xa8] sm:$0xff]   ;;  %v4813_v14 = vld [vmem:[%s6132_s3 + $0xb0] sm:$0xff]   ;;  %v4830_v15 = vld [vmem:[%s6132_s3 + $0x138] sm:$0xff]  }
 0x141   : > { %v5335_v54 = vmax.f32 %v5281_v32, %v842_v40  ;;  %v843_v46 = vmax.f32 %v819_v39, %v827_v41  ;;  %4476 = vmatpush3.bf16.msra.mxu1 %v5249_v45  ;;  %v4816_v16 = vld [vmem:[%s6132_s3 + $0xc8] sm:$0xff]   ;;  %v4817_v39 = vld [vmem:[%s6132_s3 + $0xd0] sm:$0xff]   ;;  %v4831_v11 = vld [vmem:[%s6132_s3 + $0x140] sm:$0xff]  }
 0x142   : > { %v5339_v47 = vmax.f32 %v5283_v35, %v840_v43  ;;  %v841_v48 = vmax.f32 %v817_v42, %v825_v44  ;;  %4477 = vmatprep.subr.bf16.mxu1 %v4800_v34  ;;  %v5358_v52 = vld [vmem:[#allocation2 + $0x32] sm:$0xff]  ;;  %v4819_v44 = vld [vmem:[%s6132_s3 + $0xe0] sm:$0xff]  }
 0x143   : > { %884 = vst [vmem:[#allocation2 + $0x71] sm:$0xff] %v5335_v54  ;;  %v5346_v50 = vmax.f32 %v5285_v37, %v843_v46  ;;  %v5356_v35 = vld [vmem:[#allocation2 + $0x10] sm:$0xff]  ;;  %v4818_v42 = vld [vmem:[%s6132_s3 + $0xd8] sm:$0xff]   ;;  %v4820_v46 = vld [vmem:[%s6132_s3 + $0xe8] sm:$0xff]  }
 0x144   : > { %882 = vst [vmem:[#allocation2 + $0x51] sm:$0xff] %v5339_v47  ;;  %v5350_v32 = vmax.f32 %v5287_v38, %v841_v48  ;;  %v5354_v45 = vpack.c.bf16 %v5339_v47, %v5308_v21  ;;  %v5360_v53 = vld [vmem:[#allocation2 + $0x42] sm:$0xff]  ;;  %v5378_v58 = vld [vmem:[#allocation2 + $0x12] sm:$0xff]  ;;  %v894_v59 = vpack.c.bf16 %v5356_v35, %v886_v51 }
 0x145   : > { %885 = vst [vmem:[#allocation2 + $0x81] sm:$0xff] %v5346_v50  ;;  %4478 = vmatpush3.bf16.msra.mxu1 %v4800_v34  ;;  %v5363_v37 = vld [vmem:[#allocation2 + $0x22] sm:$0xff]  ;;  %v1480_v55 = vpack.c.bf16 %v5346_v50, %v5335_v54  ;;  %v1628_v38 = vpack.c.bf16 %v5360_v53, %v5358_v52  ;;  %v5409_v9 = vld [vmem:[#allocation2 + $0x30] sm:$0xff]  ;;  %v1177_v25 = vpack.c.bf16 %v5378_v58, %v1169_v22 }
 0x146   : > { %883 = vst [vmem:[#allocation2 + $0x61] sm:$0xff] %v5350_v32  ;;  %4471 = vmatprep.mubr.bf16.mxu1 %v5354_v45  ;;  %4479 = vmatprep.subr.bf16.mxu1 %v4801_v49  ;;  %v5373_v56 = vpack.c.bf16 %v5335_v54, %v5350_v32  ;;  %v1479_v60 = vpack.c.bf16 %v5350_v32, %v5339_v47  ;;  %v888_v6 = vld [vmem:[#allocation2 + $0x20] sm:$0xff]  ;;  %v4821_v48 = vld [vmem:[%s6132_s3 + $0xf0] sm:$0xff]   ;;  %v4866_v47 = vld [vmem:[%s6134_s5 + $0x8] sm:$0xff]  }
 0x147   : > { %v1627_v61 = vpack.c.bf16 %v5363_v37, %v5378_v58  ;;  %v5412_v12 = vpack.c.bf16 %v5409_v9, %v888_v6  ;;  %v5414_v13 = vld [vmem:[#allocation2 + $0x40] sm:$0xff]  ;;  %v5458_v31 = vpack.c.bf16 %v5358_v52, %v5363_v37  ;;  %v1327_v43 = vpack.c.bf16 %v888_v6, %v5356_v35  ;;  %v4828_v6 = vld [vmem:[%s6132_s3 + $0x128] sm:$0xff]   ;;  %v4867_v32 = vld [vmem:[%s6134_s5 + $0x50] sm:$0xff]  }
 0x148   : > { %4472 = vmatmul.mubr.bf16.gmra.mrb[4].mxu1 %v5373_v56  ;;  %v4823_v51 = vld [vmem:[%s6132_s3 + $0x100] sm:$0xff]   ;;  %v1328_v35 = vpack.c.bf16 %v5414_v13, %v5409_v9  ;;  %v4833_v9 = vld [vmem:[%s6132_s3 + $0x150] sm:$0xff]   ;;  %v4836_v37 = vld [vmem:[%s6132_s3 + $0x168] sm:$0xff]  }
 0x149   : > { %4480 = vmatpush3.bf16.msra.mxu1 %v4801_v49  ;;  %4491 = vmatprep.mubr.bf16.mxu1 %v894_v59  ;;  %v4822_v49 = vld [vmem:[%s6132_s3 + $0xf8] sm:$0xff]   ;;  %v4863_v10 = vld [vmem:[%s6134_s5 + $0x40] sm:$0xff]   ;;  %v4873_v22 = vld [vmem:[%s6134_s5 + $0x68] sm:$0xff]  }
 0x14a   : > { %4481 = vmatprep.subr.bf16.mxu1 %v4802_v57  ;;  %v5430_v23 = vld [vmem:[#allocation2 + $0x70] sm:$0xff]  ;;  %v4864_v21 = vld [vmem:[%s6134_s5] sm:$0xff]   ;;  %4237 = vmatprep.subr.bf16.mxu0 %v4863_v10  ;;  %v4869_v58 = vld [vmem:[%s6134_s5 + $0x58] sm:$0xff]  }
 0x14b   : > { %v5389_v63 = vld [vmem:[#allocation2 + $0x52] sm:$0xff]  ;;  %v4835_v54 = vld [vmem:[%s6132_s3 + $0x160] sm:$0xff]   ;;  %4238 = vmatpush3.bf16.msra.mxu0 %v4864_v21 }
 0x14c   : > { %v5407_v7 = vld [vmem:[#allocation2 + $0x50] sm:$0xff]  ;;  %v5465_v34 = vpack.c.bf16 %v5389_v63, %v5360_v53  ;;  %v4842_v52 = vld [vmem:[%s6132_s3 + $0x198] sm:$0xff]   ;;  %v4843_v53 = vld [vmem:[%s6132_s3 + $0x1a0] sm:$0xff]  }
 0x14d   : > { %4482 = vmatpush3.bf16.msra.mxu1 %v4802_v57  ;;  %v5391_v0 = vld [vmem:[#allocation2 + $0x62] sm:$0xff]  ;;  %v5421_v18 = vpack.c.bf16 %v5407_v7, %v5414_v13  ;;  %v5472_v40 = vld [vmem:[#allocation2 + $0x72] sm:$0xff] }
 0x14e   : > { %4483 = vmatprep.subr.bf16.mxu1 %v4803_v62  ;;  %v1629_v2 = vpack.c.bf16 %v5391_v0, %v5389_v63  ;;  %v5428_v20 = vld [vmem:[#allocation2 + $0x60] sm:$0xff]  ;;  %v5476_v41 = vpack.c.bf16 %v5472_v40, %v5391_v0  ;;  %v4824_v57 = vld [vmem:[%s6132_s3 + $0x108] sm:$0xff]   ;;  %v4834_v13 = vld [vmem:[%s6132_s3 + $0x158] sm:$0xff]  }
 0x14f   : > { %v5434_v8 = vpack.c.bf16 %v5430_v23, %v5428_v20  ;;  %v1329_v59 = vpack.c.bf16 %v5428_v20, %v5407_v7  ;;  %v4829_v7 = vld [vmem:[%s6132_s3 + $0x130] sm:$0xff]   ;;  %v4872_v20 = vld [vmem:[%s6134_s5 + $0x20] sm:$0xff]   ;;  %v4846_v0 = vld [vmem:[%s6132_s3 + $0x1b8] sm:$0xff]  }
 0x150   : > { %v4845_v63 = vld [vmem:[%s6132_s3 + $0x1b0] sm:$0xff]  }
 0x151   : > { %4484 = vmatpush3.bf16.msra.mxu1 %v4803_v62  ;;  %v4825_v62 = vld [vmem:[%s6132_s3 + $0x110] sm:$0xff]  }
 0x152   : > { %4485 = vmatprep.subr.bf16.mxu1 %v4804_v1 }
 0x155   : > { %4486 = vmatpush3.bf16.msra.mxu1 %v4804_v1  ;;  %v5508_v1 = vld [vmem:[#allocation2 + $0x80] sm:$0xff] }
 0x156   : > { %4487 = vmatprep.subr.bf16.mxu1 %v4805_v3 }
 0x159   : > { %4488 = vmatpush3.bf16.msra.mxu1 %v4805_v3  ;;  %v1330_v3 = vpack.c.bf16 %v5508_v1, %v5430_v23  ;;  %v4839_v23 = vld [vmem:[%s6132_s3 + $0x180] sm:$0xff]  }
 0x15a   : > { %4489 = vmatprep.subr.bf16.mxu1 %v4806_v4 }
 0x15d   : > { %4490 = vmatpush3.bf16.msra.mxu1 %v4806_v4  ;;  %v4826_v4 = vld [vmem:[%s6132_s3 + $0x118] sm:$0xff]  }
 0x15e   : > { %4499 = vmatprep.subr.bf16.mxu1 %v4807_v5 }
 0x160   : > { %4492 = vmatmul.mubr.bf16.vlgmr.msra.gmra.mrb[0].mxu1 %v5412_v12 }
 0x161   : > { %4495 = vmatprep.mubr.bf16.mxu1 %v5421_v18  ;;  %4500 = vmatpush3.bf16.msra.mxu1 %v4807_v5  ;;  %v4827_v5 = vld [vmem:[%s6132_s3 + $0x120] sm:$0xff]  }
 0x162   : > { %4501 = vmatprep.subr.bf16.mxu1 %v4808_v17 }
 0x165   : > { %4502 = vmatpush3.bf16.msra.mxu1 %v4808_v17  ;;  %v4871_v17 = vld [vmem:[%s6134_s5 + $0x60] sm:$0xff]  }
 0x166   : > { %4503 = vmatprep.subr.bf16.mxu1 %v4809_v19 }
 0x168   : > { %4496 = vmatmul.mubr.bf16.gmra.mrb[4].mxu1 %v5434_v8 }
 0x169   : > { %4504 = vmatpush3.bf16.msra.mxu1 %v4809_v19  ;;  %4515 = vmatprep.mubr.bf16.mxu1 %v1177_v25  ;;  %v4838_v19 = vld [vmem:[%s6132_s3 + $0x178] sm:$0xff]   ;;  %v4840_v25 = vld [vmem:[%s6132_s3 + $0x188] sm:$0xff]  }
 0x16a   : > { %4505 = vmatprep.subr.bf16.mxu1 %v4810_v24 }
 0x16d   : > { %4506 = vmatpush3.bf16.msra.mxu1 %v4810_v24  ;;  %v4874_v24 = vld [vmem:[%s6134_s5 + $0x28] sm:$0xff]  }
 0x16e   : > { %4507 = vmatprep.subr.bf16.mxu1 %v4811_v26 }
 0x171   : > { %4508 = vmatpush3.bf16.msra.mxu1 %v4811_v26  ;;  %v4841_v26 = vld [vmem:[%s6132_s3 + $0x190] sm:$0xff]  }
 0x172   : > { %4509 = vmatprep.subr.bf16.mxu1 %v4812_v27 }
 0x175   : > { %4510 = vmatpush3.bf16.msra.mxu1 %v4812_v27  ;;  %v5617_v27 = vld [vmem:[#allocation2 + $0x82] sm:$0xff] }
 0x176   : > { %4511 = vmatprep.subr.bf16.mxu1 %v4813_v14 }
 0x179   : > { %4512 = vmatpush3.bf16.msra.mxu1 %v4813_v14  ;;  %v1630_v14 = vpack.c.bf16 %v5617_v27, %v5472_v40  ;;  %v4853_v40 = vld [vmem:[%s6132_s3 + $0x1f0] sm:$0xff]  }
 0x17a   : > { %4513 = vmatprep.subr.bf16.mxu1 %v4814_v28 }
 0x17d   : > { %4514 = vmatpush3.bf16.msra.mxu1 %v4814_v28  ;;  %v4849_v28 = vld [vmem:[%s6132_s3 + $0x1d0] sm:$0xff]  }
 0x17e   : > { %4523 = vmatprep.subr.bf16.mxu1 %v4815_v29 }
 0x180   : > { %4516 = vmatmul.mubr.bf16.vlgmr.msra.gmra.mrb[0].mxu1 %v5458_v31 }
 0x181   : > { %4519 = vmatprep.mubr.bf16.mxu1 %v5465_v34  ;;  %4524 = vmatpush3.bf16.msra.mxu1 %v4815_v29  ;;  %v1777_v29 = vld [vmem:[#allocation2 + $0x90] sm:$0xff] }
 0x182   : > { %4525 = vmatprep.subr.bf16.mxu1 %v4816_v16 }
 0x185   : > { %4526 = vmatpush3.bf16.msra.mxu1 %v4816_v16  ;;  %v1781_v16 = vpack.c.bf16 %v1777_v29, %v5508_v1  ;;  %v3977_v1 = vld [vmem:[%s6133_s4] ss:$0 sm:$0xff]  ;;  %v4884_v29 = vld [vmem:[%s6134_s5 + $0x90] sm:$0xff]  }
 0x186   : > { %4527 = vmatprep.subr.bf16.mxu1 %v4817_v39 }
 0x188   : > { %4520 = vmatmul.mubr.bf16.gmra.mrb[4].mxu1 %v5476_v41 }
 0x189   : > { %4528 = vmatpush3.bf16.msra.mxu1 %v4817_v39  ;;  %4539 = vmatprep.mubr.bf16.mxu1 %v1327_v43  ;;  %v4850_v39 = vld [vmem:[%s6132_s3 + $0x1d8] sm:$0xff]   ;;  %v4856_v43 = vld [vmem:[%s6132_s3 + $0x208] sm:$0xff]  }
 0x18a   : > { %4529 = vmatprep.subr.bf16.mxu1 %v4818_v42 }
 0x18d   : > { %4530 = vmatpush3.bf16.msra.mxu1 %v4818_v42  ;;  %v4855_v42 = vld [vmem:[%s6132_s3 + $0x200] sm:$0xff]  }
 0x18e   : > { %4531 = vmatprep.subr.bf16.mxu1 %v4819_v44 }
 0x191   : > { %4532 = vmatpush3.bf16.msra.mxu1 %v4819_v44  ;;  %v4857_v44 = vld [vmem:[%s6132_s3 + $0x210] sm:$0xff]  }
 0x192   : > { %4533 = vmatprep.subr.bf16.mxu1 %v4820_v46 }
 0x195   : > { %4534 = vmatpush3.bf16.msra.mxu1 %v4820_v46  ;;  %v1927_v46 = vld [vmem:[#allocation2 + $0x91] sm:$0xff] }
 0x196   : > { %4535 = vmatprep.subr.bf16.mxu1 %v4821_v48 }
 0x199   : > { %4536 = vmatpush3.bf16.msra.mxu1 %v4821_v48  ;;  %v1931_v48 = vpack.c.bf16 %v1927_v46, %v5346_v50  ;;  %v4860_v50 = vld [vmem:[%s6132_s3 + $0x228] sm:$0xff]   ;;  %v4893_v46 = vld [vmem:[%s6134_s5 + $0xf8] sm:$0xff]  }
 0x19a   : > { %4537 = vmatprep.subr.bf16.mxu1 %v4822_v49 }
 0x19d   : > { %4538 = vmatpush3.bf16.msra.mxu1 %v4822_v49  ;;  %v4858_v49 = vld [vmem:[%s6132_s3 + $0x218] sm:$0xff]  }
 0x19e   : > { %4547 = vmatprep.subr.bf16.mxu1 %v4823_v51 }
 0x1a0   : > { %4540 = vmatmul.mubr.bf16.vlgmr.msra.gmra.mrb[0].mxu1 %v1328_v35 }
 0x1a1   : > { %4543 = vmatprep.mubr.bf16.mxu1 %v1329_v59  ;;  %4548 = vmatpush3.bf16.msra.mxu1 %v4823_v51  ;;  %v2077_v51 = vld [vmem:[#allocation2 + $0x92] sm:$0xff] }
 0x1a2   : > { %4549 = vmatprep.subr.bf16.mxu1 %v4824_v57  ;;  %v2081_v35 = vpack.c.bf16 %v2077_v51, %v5617_v27  ;;  %v4876_v59 = vld [vmem:[%s6134_s5 + $0x30] sm:$0xff]  }
 0x1a5   : > { %4550 = vmatpush3.bf16.msra.mxu1 %v4824_v57  ;;  %v4875_v57 = vld [vmem:[%s6134_s5 + $0x70] sm:$0xff]  }
 0x1a6   : > { %4551 = vmatprep.subr.bf16.mxu1 %v4825_v62 }
 0x1a8   : > { %4544 = vmatmul.mubr.bf16.gmra.mrb[4].mxu1 %v1330_v3 }
 0x1a9   : > { %4552 = vmatpush3.bf16.msra.mxu1 %v4825_v62  ;;  %4563 = vmatprep.mubr.bf16.mxu1 %v1477_v36  ;;  %v4832_v36 = vld [vmem:[%s6132_s3 + $0x148] sm:$0xff]   ;;  %v4879_v62 = vld [vmem:[%s6134_s5 + $0xc0] sm:$0xff]  }
 0x1aa   : > { %4553 = vmatprep.subr.bf16.mxu1 %v4826_v4 }
 0x1ad   : > { %4554 = vmatpush3.bf16.msra.mxu1 %v4826_v4 }
 0x1ae   : > { %4555 = vmatprep.subr.bf16.mxu1 %v4827_v5 }
 0x1b1   : > { %4556 = vmatpush3.bf16.msra.mxu1 %v4827_v5 }
 0x1b2   : > { %4557 = vmatprep.subr.bf16.mxu1 %v4828_v6 }
 0x1b5   : > { %4558 = vmatpush3.bf16.msra.mxu1 %v4828_v6 }
 0x1b6   : > { %4559 = vmatprep.subr.bf16.mxu1 %v4829_v7 }
 0x1b9   : > { %4560 = vmatpush3.bf16.msra.mxu1 %v4829_v7 }
 0x1ba   : > { %4561 = vmatprep.subr.bf16.mxu1 %v4830_v15 }
 0x1bd   : > { %4562 = vmatpush3.bf16.msra.mxu1 %v4830_v15 }
 0x1be   : > { %4571 = vmatprep.subr.bf16.mxu1 %v4831_v11 }
 0x1c0   : > { %4564 = vmatmul.mubr.bf16.vlgmr.msra.gmra.mrb[0].mxu1 %v1478_v30  ;;  %v4865_v30 = vld [vmem:[%s6134_s5 + $0x48] sm:$0xff]  }
 0x1c1   : > { %4567 = vmatprep.mubr.bf16.mxu1 %v1479_v60  ;;  %4572 = vmatpush3.bf16.msra.mxu1 %v4831_v11  ;;  %v4837_v60 = vld [vmem:[%s6132_s3 + $0x170] sm:$0xff]  }
 0x1c2   : > { %4573 = vmatprep.subr.bf16.mxu1 %v4832_v36  ;;  %4239 = vmatprep.subr.bf16.mxu0 %v4865_v30 }
 0x1c3   : > { %4240 = vmatpush3.bf16.msra.mxu0 %v4866_v47 }
 0x1c4   : > { %4241 = vmatprep.subr.bf16.mxu0 %v4867_v32 }
 0x1c5   : > { %4574 = vmatpush3.bf16.msra.mxu1 %v4832_v36 }
 0x1c6   : > { %4575 = vmatprep.subr.bf16.mxu1 %v4833_v9 }
 0x1c8   : > { %4568 = vmatmul.mubr.bf16.gmra.mrb[4].mxu1 %v1480_v55  ;;  %v4868_v55 = vld [vmem:[%s6134_s5 + $0x10] sm:$0xff]  }
 0x1c9   : > { %4576 = vmatpush3.bf16.msra.mxu1 %v4833_v9  ;;  %4587 = vmatprep.mubr.bf16.mxu1 %v1627_v61  ;;  %v4870_v61 = vld [vmem:[%s6134_s5 + $0x18] sm:$0xff]  }
 0x1ca   : > { %4577 = vmatprep.subr.bf16.mxu1 %v4834_v13  ;;  %4242 = vmatpush3.bf16.msra.mxu0 %v4868_v55 }
 0x1cb   : > { %4243 = vmatprep.subr.bf16.mxu0 %v4869_v58 }
 0x1cd   : > { %4578 = vmatpush3.bf16.msra.mxu1 %v4834_v13 }
 0x1ce   : > { %4579 = vmatprep.subr.bf16.mxu1 %v4835_v54  ;;  %4244 = vmatpush3.bf16.msra.mxu0 %v4870_v61 }
 0x1cf   : > { %4245 = vmatprep.subr.bf16.mxu0 %v4871_v17 }
 0x1d1   : > { %4580 = vmatpush3.bf16.msra.mxu1 %v4835_v54 }
 0x1d2   : > { %4581 = vmatprep.subr.bf16.mxu1 %v4836_v37  ;;  %4246 = vmatpush3.bf16.msra.mxu0 %v4872_v20 }
 0x1d3   : > { %4247 = vmatprep.subr.bf16.mxu0 %v4873_v22 }
 0x1d5   : > { %4582 = vmatpush3.bf16.msra.mxu1 %v4836_v37 }
 0x1d6   : > { %4583 = vmatprep.subr.bf16.mxu1 %v4837_v60  ;;  %4248 = vmatpush3.bf16.msra.mxu0 %v4874_v24 }
 0x1d7   : > { %4249 = vmatprep.subr.bf16.mxu0 %v4875_v57 }
 0x1d9   : > { %4584 = vmatpush3.bf16.msra.mxu1 %v4837_v60 }
 0x1da   : > { %4585 = vmatprep.subr.bf16.mxu1 %v4838_v19  ;;  %4250 = vmatpush3.bf16.msra.mxu0 %v4876_v59  ;;  %v4898_v59 = vld [vmem:[%s6134_s5 + $0x108] sm:$0xff]  }
 0x1dd   : > { %4586 = vmatpush3.bf16.msra.mxu1 %v4838_v19 }
 0x1de   : > { %4595 = vmatprep.subr.bf16.mxu1 %v4839_v23 }
 0x1e0   : > { %4588 = vmatmul.mubr.bf16.vlgmr.msra.gmra.mrb[0].mxu1 %v1628_v38  ;;  %v4844_v38 = vld [vmem:[%s6132_s3 + $0x1a8] sm:$0xff]  }
 0x1e1   : > { %4591 = vmatprep.mubr.bf16.mxu1 %v1629_v2  ;;  %4596 = vmatpush3.bf16.msra.mxu1 %v4839_v23  ;;  %v4847_v2 = vld [vmem:[%s6132_s3 + $0x1c0] sm:$0xff]  }
 0x1e2   : > { %4597 = vmatprep.subr.bf16.mxu1 %v4840_v25 }
 0x1e5   : > { %4598 = vmatpush3.bf16.msra.mxu1 %v4840_v25 }
 0x1e6   : > { %4599 = vmatprep.subr.bf16.mxu1 %v4841_v26 }
 0x1e8   : > { %4592 = vmatmul.mubr.bf16.gmra.mrb[4].mxu1 %v1630_v14 }
 0x1e9   : > { %4600 = vmatpush3.bf16.msra.mxu1 %v4841_v26  ;;  %4611 = vmatprep.mubr.bf16.mxu1 %v5412_v12  ;;  %v4848_v12 = vld [vmem:[%s6132_s3 + $0x1c8] sm:$0xff]  }
 0x1ea   : > { %4601 = vmatprep.subr.bf16.mxu1 %v4842_v52 }
 0x1ed   : > { %4602 = vmatpush3.bf16.msra.mxu1 %v4842_v52 }
 0x1ee   : > { %4603 = vmatprep.subr.bf16.mxu1 %v4843_v53 }
 0x1f1   : > { %4604 = vmatpush3.bf16.msra.mxu1 %v4843_v53 }
 0x1f2   : > { %4605 = vmatprep.subr.bf16.mxu1 %v4844_v38 }
 0x1f5   : > { %4606 = vmatpush3.bf16.msra.mxu1 %v4844_v38  ;;  %v4880_v38 = vld [vmem:[%s6134_s5 + $0x80] sm:$0xff]  }
 0x1f6   : > { %4607 = vmatprep.subr.bf16.mxu1 %v4845_v63 }
 0x1f9   : > { %4608 = vmatpush3.bf16.msra.mxu1 %v4845_v63 }
 0x1fa   : > { %4609 = vmatprep.subr.bf16.mxu1 %v4846_v0 }
 0x1fd   : > { %4610 = vmatpush3.bf16.msra.mxu1 %v4846_v0  ;;  %v4881_v0 = vld [vmem:[%s6134_s5 + $0xc8] sm:$0xff]  }
 0x1fe   : > { %4619 = vmatprep.subr.bf16.mxu1 %v4847_v2 }
 0x200   : > { %4612 = vmatmul.mubr.bf16.vlgmr.msra.gmra.mrb[0].mxu1 %v5421_v18  ;;  %v4851_v18 = vld [vmem:[%s6132_s3 + $0x1e0] sm:$0xff]  }
 0x201   : > { %4615 = vmatprep.mubr.bf16.mxu1 %v5434_v8  ;;  %4620 = vmatpush3.bf16.msra.mxu1 %v4847_v2  ;;  %v4852_v8 = vld [vmem:[%s6132_s3 + $0x1e8] sm:$0xff]  }
 0x202   : > { %4621 = vmatprep.subr.bf16.mxu1 %v4848_v12 }
 0x205   : > { %4622 = vmatpush3.bf16.msra.mxu1 %v4848_v12  ;;  %v4882_v12 = vld [vmem:[%s6134_s5 + $0x88] sm:$0xff]  }
 0x206   : > { %4623 = vmatprep.subr.bf16.mxu1 %v4849_v28 }
 0x208   : > { %4616 = vmatmul.mubr.bf16.gmra.mrb[4].mxu1 %v1781_v16  ;;  %v4885_v16 = vld [vmem:[%s6134_s5 + $0xd8] sm:$0xff]  }
 0x209   : > { %4624 = vmatpush3.bf16.msra.mxu1 %v4849_v28  ;;  %4635 = vmatprep.mubr.bf16.mxu1 %v5326_v33  ;;  %v4854_v33 = vld [vmem:[%s6132_s3 + $0x1f8] sm:$0xff]   ;;  %v4883_v28 = vld [vmem:[%s6134_s5 + $0xd0] sm:$0xff]  }
 0x20a   : > { %4625 = vmatprep.subr.bf16.mxu1 %v4850_v39 }
 0x20d   : > { %4626 = vmatpush3.bf16.msra.mxu1 %v4850_v39  ;;  %v4886_v39 = vld [vmem:[%s6134_s5 + $0x98] sm:$0xff]  }
 0x20e   : > { %4627 = vmatprep.subr.bf16.mxu1 %v4851_v18 }
 0x211   : > { %4628 = vmatpush3.bf16.msra.mxu1 %v4851_v18  ;;  %v4887_v18 = vld [vmem:[%s6134_s5 + $0xe0] sm:$0xff]  }
 0x212   : > { %4629 = vmatprep.subr.bf16.mxu1 %v4852_v8 }
 0x215   : > { %4630 = vmatpush3.bf16.msra.mxu1 %v4852_v8  ;;  %v4888_v8 = vld [vmem:[%s6134_s5 + $0xa0] sm:$0xff]  }
 0x216   : > { %4631 = vmatprep.subr.bf16.mxu1 %v4853_v40 }
 0x219   : > { %4632 = vmatpush3.bf16.msra.mxu1 %v4853_v40  ;;  %v4889_v40 = vld [vmem:[%s6134_s5 + $0xe8] sm:$0xff]  }
 0x21a   : > { %4633 = vmatprep.subr.bf16.mxu1 %v4854_v33 }
 0x21d   : > { %4634 = vmatpush3.bf16.msra.mxu1 %v4854_v33  ;;  %v4890_v33 = vld [vmem:[%s6134_s5 + $0xa8] sm:$0xff]  }
 0x21e   : > { %4643 = vmatprep.subr.bf16.mxu1 %v4855_v42 }
 0x220   : > { %4636 = vmatmul.mubr.bf16.vlgmr.msra.gmra.mrb[0].mxu1 %v5354_v45  ;;  %v4859_v45 = vld [vmem:[%s6132_s3 + $0x220] sm:$0xff]  }
 0x221   : > { %4639 = vmatprep.mubr.bf16.mxu1 %v5373_v56  ;;  %4644 = vmatpush3.bf16.msra.mxu1 %v4855_v42  ;;  %v4861_v56 = vld [vmem:[%s6132_s3 + $0x230] sm:$0xff]  }
 0x222   : > { %4645 = vmatprep.subr.bf16.mxu1 %v4856_v43  ;;  %v4891_v42 = vld [vmem:[%s6134_s5 + $0xf0] sm:$0xff]  }
 0x225   : > { %4646 = vmatpush3.bf16.msra.mxu1 %v4856_v43 }
 0x226   : > { %4647 = vmatprep.subr.bf16.mxu1 %v4857_v44 }
 0x228   : > { %4640 = vmatmul.mubr.bf16.gmra.mrb[4].mxu1 %v1931_v48 }
 0x229   : > { %4648 = vmatpush3.bf16.msra.mxu1 %v4857_v44  ;;  %4659 = vmatprep.mubr.bf16.mxu1 %v5458_v31  ;;  %v4862_v31 = vld [vmem:[%s6132_s3 + $0x238] sm:$0xff]   ;;  %v4892_v44 = vld [vmem:[%s6134_s5 + $0xb0] sm:$0xff]  }
 0x22a   : > { %4649 = vmatprep.subr.bf16.mxu1 %v4858_v49 }
 0x22d   : > { %4650 = vmatpush3.bf16.msra.mxu1 %v4858_v49  ;;  %v4894_v49 = vld [vmem:[%s6134_s5 + $0xb8] sm:$0xff]  }
 0x22e   : > { %4651 = vmatprep.subr.bf16.mxu1 %v4859_v45 }
 0x231   : > { %4652 = vmatpush3.bf16.msra.mxu1 %v4859_v45 }
 0x232   : > { %4653 = vmatprep.subr.bf16.mxu1 %v4860_v50 }
 0x235   : > { %4654 = vmatpush3.bf16.msra.mxu1 %v4860_v50  ;;  %v4895_v50 = vld [vmem:[%s6134_s5 + $0x140] sm:$0xff]  }
 0x236   : > { %4655 = vmatprep.subr.bf16.mxu1 %v4861_v56 }
 0x239   : > { %4656 = vmatpush3.bf16.msra.mxu1 %v4861_v56 }
 0x23a   : > { %4657 = vmatprep.subr.bf16.mxu1 %v4862_v31 }
 0x23d   : > { %4658 = vmatpush3.bf16.msra.mxu1 %v4862_v31  ;;  %v4896_v31 = vld [vmem:[%s6134_s5 + $0x100] sm:$0xff]  }
 0x240   : > { %4660 = vmatmul.mubr.bf16.vlgmr.msra.gmra.mrb[0].mxu1 %v5465_v34  ;;  %v4877_v34 = vld [vmem:[%s6134_s5 + $0x78] sm:$0xff]  }
 0x241   : > { %4663 = vmatprep.mubr.bf16.mxu1 %v5476_v41  ;;  %v4878_v41 = vld [vmem:[%s6134_s5 + $0x38] sm:$0xff]   ;;  %4251 = vmatprep.subr.bf16.mxu0 %v4877_v34  ;;  %v4899_v34 = vld [vmem:[%s6134_s5 + $0x150] sm:$0xff]  }
 0x242   : > { %4252 = vmatpush3.bf16.msra.mxu0 %v4878_v41  ;;  %v4900_v41 = vld [vmem:[%s6134_s5 + $0x110] sm:$0xff]  }
 0x243   : > { %4259 = vmatprep.subr.bf16.mxu0 %v4879_v62  ;;  %v4901_v62 = vld [vmem:[%s6134_s5 + $0x158] sm:$0xff]  }
 0x248   : > { %4664 = vmatmul.mubr.bf16.gmra.mrb[4].mxu1 %v2081_v35  ;;  %v4897_v35 = vld [vmem:[%s6134_s5 + $0x148] sm:$0xff]  }
 0x313   : > { %v4661_v3 = vpop.f32.mrb[0].mxu1 }
 0x314   : > { %v2229_v4 = vadd.f32 %v4661_v3, %v3977_v1  ;;  %v2181_v5 = vpop.f32.mrb[1].mxu1  ;;  %v4903_v3 = vld [vmem:[%s6134_s5 + $0x160] sm:$0xff]  }
 0x315   : > { %v2227_v6 = vadd.f32 %v3977_v1, %v2181_v5  ;;  %v4662_v7 = vpop.f32.mrb[2].mxu1  ;;  %v4905_v5 = vld [vmem:[%s6134_s5 + $0x168] sm:$0xff]  }
 0x316   : > { %v2230_v15 = vadd.f32 %v4662_v7, %v3977_v1  ;;  %v2184_v11 = vpop.f32.mrb[3].mxu1  ;;  %v2237_v9 = vmax.f32 %v2229_v4, 0.0  ;;  %v4904_v4 = vld [vmem:[%s6134_s5 + $0x120] sm:$0xff]   ;;  %v4907_v7 = vld [vmem:[%s6134_s5 + $0x170] sm:$0xff]  }
 0x317   : > { %v2228_v36 = vadd.f32 %v3977_v1, %v2184_v11  ;;  %v2235_v10 = vmax.f32 %v2227_v6, 0.0  ;;  %v4906_v6 = vld [vmem:[%s6134_s5 + $0x128] sm:$0xff]   ;;  %v4909_v11 = vld [vmem:[%s6134_s5 + $0x178] sm:$0xff]  }
 0x318   : > { %v2238_v13 = vmax.f32 %v2230_v15, 0.0  ;;  %v4908_v15 = vld [vmem:[%s6134_s5 + $0x130] sm:$0xff]  }
 0x319   : > { %v2236_v21 = vmax.f32 %v2228_v36, 0.0  ;;  %v4910_v36 = vld [vmem:[%s6134_s5 + $0x138] sm:$0xff]  }
 0x31a   : > { %v2248_v30 = vmax.f32 %v2237_v9, %v2238_v13  ;;  %v4911_v9 = vld [vmem:[%s6134_s5 + $0x1c0] sm:$0xff]  }
 0x31b   : > { %v2243_v54 = vmax.f32 %v2235_v10, %v2236_v21  ;;  %v4665_v47 = vpop.f32.mrb[4].mxu1  ;;  %v4912_v10 = vld [vmem:[%s6134_s5 + $0x180] sm:$0xff]  }
 0x31c   : > { %v2233_v32 = vadd.f32 %v4665_v47, %v3977_v1  ;;  %v2197_v37 = vpop.f32.mrb[5].mxu1  ;;  %v2250_v43 = vrot.slane %v2248_v30, 1  ;;  %v4914_v47 = vld [vmem:[%s6134_s5 + $0x188] sm:$0xff]  }
 0x31d   : > { %v2245_v55 = vrot.slane %v2243_v54, 1  ;;  %v2231_v58 = vadd.f32 %v3977_v1, %v2197_v37  ;;  %v4666_v60 = vpop.f32.mrb[6].mxu1  ;;  %v4916_v37 = vld [vmem:[%s6134_s5 + $0x190] sm:$0xff]  }
 0x31e   : > { %v2234_v61 = vadd.f32 %v4666_v60, %v3977_v1  ;;  %v2200_v17 = vpop.f32.mrb[7].mxu1  ;;  %v2241_v22 = vmax.f32 %v2233_v32, 0.0  ;;  %v5760_v48 = vmax.f32 %v2248_v30, %v2250_v43  ;;  %v4913_v30 = vld [vmem:[%s6134_s5 + $0x1c8] sm:$0xff]   ;;  %v4915_v32 = vld [vmem:[%s6134_s5 + $0x1d0] sm:$0xff]   ;;  %v4919_v60 = vld [vmem:[%s6134_s5 + $0x1e0] sm:$0xff]  }
 0x31f   : > { %v2247_v19 = vmax.f32 %v2243_v54, %v2245_v55  ;;  %v2232_v20 = vadd.f32 %v3977_v1, %v2200_v17  ;;  %v2239_v24 = vmax.f32 %v2231_v58, 0.0  ;;  %v4902_v1 = vld [vmem:[%s6134_s5 + $0x118] sm:$0xff]   ;;  %v4921_v17 = vld [vmem:[%s6134_s5 + $0x1e8] sm:$0xff]   ;;  %v4940_v43 = vld [vmem:[%s6134_s5 + $0x230] sm:$0xff]  }
 0x320   : > { %v2242_v23 = vmax.f32 %v2234_v61, 0.0  ;;  %v2271_v56 = vrot.slane %v5760_v48, 2  ;;  %v2275_v13 = vrot.slane %v5760_v48, 6  ;;  %v2295_v21 = vpack.c.bf16 %v5760_v48, %v5760_v48  ;;  %v4917_v55 = vld [vmem:[%s6134_s5 + $0x1d8] sm:$0xff]   ;;  %v4920_v61 = vld [vmem:[%s6134_s5 + $0x1a0] sm:$0xff]  }
 0x321   : > { %v2240_v25 = vmax.f32 %v2232_v20, 0.0  ;;  %v2264_v26 = vrot.slane %v2247_v19, 2  ;;  %v2268_v27 = vrot.slane %v2247_v19, 6  ;;  %v2291_v63 = vpack.c.bf16 %v2247_v19, %v2247_v19  ;;  %v4918_v58 = vld [vmem:[%s6134_s5 + $0x198] sm:$0xff]   ;;  %v4923_v20 = vld [vmem:[%s6134_s5 + $0x1f0] sm:$0xff]  }
 0x322   : > { %v5714_v14 = vmax.f32 %v2241_v22, %v2242_v23  ;;  %v2266_v45 = vrot.slane %v2247_v19, 4  ;;  %v2296_v57 = vpack.c.bf16 %v2271_v56, %v2271_v56  ;;  %v2298_v54 = vpack.c.bf16 %v2275_v13, %v2275_v13  ;;  %v4922_v19 = vld [vmem:[%s6134_s5 + $0x1a8] sm:$0xff]   ;;  %v4924_v23 = vld [vmem:[%s6134_s5 + $0x1b0] sm:$0xff]  }
 0x323   : > { %v5716_v52 = vmax.f32 %v2239_v24, %v2240_v25  ;;  %v2292_v53 = vpack.c.bf16 %v2264_v26, %v2264_v26  ;;  %v2294_v2 = vpack.c.bf16 %v2268_v27, %v2268_v27  ;;  %v4925_v24 = vld [vmem:[%s6134_s5 + $0x1f8] sm:$0xff]   ;;  %v2273_v27 = vrot.slane %v5760_v48, 4  ;;  %v4943_v48 = vld [vmem:[%s6134_s5 + $0x2c0] sm:$0xff]   ;;  %v4945_v56 = vld [vmem:[%s6134_s5 + $0x2c8] sm:$0xff]  }
 0x324   : > { %v2293_v51 = vpack.c.bf16 %v2266_v45, %v2266_v45  ;;  %v4926_v26 = vld [vmem:[%s6134_s5 + $0x1b8] sm:$0xff]   ;;  %v4944_v45 = vld [vmem:[%s6134_s5 + $0x280] sm:$0xff]  }
 0x325   : > { %3364 = vmatprep.mubr.bf16.mxu0 %v2292_v53  ;;  %v2255_v22 = vrot.slane %v5716_v52, 1  ;;  %v4927_v53 = vld [vmem:[%s6134_s5 + $0x240] sm:$0xff]  }
 0x326   : > { %3365 = vmatmul.mubr.bf16.vlgmr.msra.gmra.mrb[32].mxu0 %v2291_v63  ;;  %v2297_v63 = vpack.c.bf16 %v2273_v27, %v2273_v27 }
 0x327   : > { %4260 = vmatpush3.bf16.msra.mxu0 %v4880_v38  ;;  %3404 = vmatprep.mubr.bf16.mxu0 %v2294_v2  ;;  %v5864_v25 = vmax.f32 %v5716_v52, %v2255_v22  ;;  %v4928_v52 = vld [vmem:[%s6134_s5 + $0x200] sm:$0xff]   ;;  %v4973_v22 = vld [vmem:[%s6134_s5 + $0x378] sm:$0xff]  }
 0x328   : > { %4261 = vmatprep.subr.bf16.mxu0 %v4881_v0  ;;  %v4929_v0 = vld [vmem:[%s6134_s5 + $0x248] sm:$0xff]  }
 0x329   : > { %v2278_v38 = vrot.slane %v5864_v25, 2 }
 0x32b   : > { %4262 = vmatpush3.bf16.msra.mxu0 %v4882_v12  ;;  %v2300_v2 = vpack.c.bf16 %v2278_v38, %v2278_v38  ;;  %v4930_v12 = vld [vmem:[%s6134_s5 + $0x208] sm:$0xff]  }
 0x32c   : > { %4263 = vmatprep.subr.bf16.mxu0 %v4883_v28  ;;  %v4931_v28 = vld [vmem:[%s6134_s5 + $0x250] sm:$0xff]  }
 0x32f   : > { %4264 = vmatpush3.bf16.msra.mxu0 %v4884_v29  ;;  %v4932_v29 = vld [vmem:[%s6134_s5 + $0x210] sm:$0xff]  }
 0x330   : > { %4265 = vmatprep.subr.bf16.mxu0 %v4885_v16  ;;  %v4933_v16 = vld [vmem:[%s6134_s5 + $0x258] sm:$0xff]  }
 0x333   : > { %4266 = vmatpush3.bf16.msra.mxu0 %v4886_v39  ;;  %v4934_v39 = vld [vmem:[%s6134_s5 + $0x218] sm:$0xff]  }
 0x334   : > { %4267 = vmatprep.subr.bf16.mxu0 %v4887_v18  ;;  %v4935_v18 = vld [vmem:[%s6134_s5 + $0x260] sm:$0xff]  }
 0x337   : > { %4268 = vmatpush3.bf16.msra.mxu0 %v4888_v8  ;;  %v4936_v8 = vld [vmem:[%s6134_s5 + $0x220] sm:$0xff]  }
 0x338   : > { %4269 = vmatprep.subr.bf16.mxu0 %v4889_v40  ;;  %v4937_v40 = vld [vmem:[%s6134_s5 + $0x268] sm:$0xff]  }
 0x33b   : > { %4270 = vmatpush3.bf16.msra.mxu0 %v4890_v33  ;;  %v4938_v33 = vld [vmem:[%s6134_s5 + $0x228] sm:$0xff]  }
 0x33c   : > { %4271 = vmatprep.subr.bf16.mxu0 %v4891_v42  ;;  %v4939_v42 = vld [vmem:[%s6134_s5 + $0x270] sm:$0xff]  }
 0x33f   : > { %4272 = vmatpush3.bf16.msra.mxu0 %v4892_v44  ;;  %v4941_v44 = vld [vmem:[%s6134_s5 + $0x278] sm:$0xff]  }
 0x340   : > { %4273 = vmatprep.subr.bf16.mxu0 %v4893_v46  ;;  %v4942_v46 = vld [vmem:[%s6134_s5 + $0x238] sm:$0xff]  }
 0x343   : > { %4274 = vmatpush3.bf16.msra.mxu0 %v4894_v49  ;;  %v2282_v49 = vrot.slane %v5864_v25, 6 }
 0x344   : > { %4281 = vmatprep.subr.bf16.mxu0 %v4895_v50  ;;  %v2299_v50 = vpack.c.bf16 %v5864_v25, %v5864_v25 }
 0x346   : > { %3405 = vmatmul.mubr.bf16.vlgmr.msra.gmra.mrb[36].mxu0 %v2293_v51  ;;  %v4946_v51 = vld [vmem:[%s6134_s5 + $0x288] sm:$0xff]  }
 0x347   : > { %4282 = vmatpush3.bf16.msra.mxu0 %v4896_v31  ;;  %3444 = vmatprep.mubr.bf16.mxu0 %v2296_v57  ;;  %v2302_v31 = vpack.c.bf16 %v2282_v49, %v2282_v49  ;;  %v4948_v57 = vld [vmem:[%s6134_s5 + $0x290] sm:$0xff]  }
 0x348   : > { %4283 = vmatprep.subr.bf16.mxu0 %v4897_v35  ;;  %v4947_v35 = vld [vmem:[%s6134_s5 + $0x2d0] sm:$0xff]  }
 0x34b   : > { %4284 = vmatpush3.bf16.msra.mxu0 %v4898_v59  ;;  %v4949_v59 = vld [vmem:[%s6134_s5 + $0x2d8] sm:$0xff]  }
 0x34c   : > { %4285 = vmatprep.subr.bf16.mxu0 %v4899_v34  ;;  %v4950_v34 = vld [vmem:[%s6134_s5 + $0x298] sm:$0xff]  }
 0x34f   : > { %4286 = vmatpush3.bf16.msra.mxu0 %v4900_v41  ;;  %v4951_v41 = vld [vmem:[%s6134_s5 + $0x2e0] sm:$0xff]  }
 0x350   : > { %4287 = vmatprep.subr.bf16.mxu0 %v4901_v62  ;;  %v4952_v62 = vld [vmem:[%s6134_s5 + $0x2a0] sm:$0xff]  }
 0x353   : > { %4288 = vmatpush3.bf16.msra.mxu0 %v4902_v1  ;;  %v4953_v1 = vld [vmem:[%s6134_s5 + $0x2e8] sm:$0xff]  }
 0x354   : > { %4289 = vmatprep.subr.bf16.mxu0 %v4903_v3  ;;  %v4954_v3 = vld [vmem:[%s6134_s5 + $0x2a8] sm:$0xff]  }
 0x357   : > { %4290 = vmatpush3.bf16.msra.mxu0 %v4904_v4  ;;  %v4955_v4 = vld [vmem:[%s6134_s5 + $0x2f0] sm:$0xff]  }
 0x358   : > { %4291 = vmatprep.subr.bf16.mxu0 %v4905_v5  ;;  %v2260_v5 = vrot.slane %v5714_v14, 1 }
 0x35b   : > { %4292 = vmatpush3.bf16.msra.mxu0 %v4906_v6  ;;  %v4956_v6 = vld [vmem:[%s6134_s5 + $0x2b0] sm:$0xff]  }
 0x35c   : > { %4293 = vmatprep.subr.bf16.mxu0 %v4907_v7  ;;  %v4957_v7 = vld [vmem:[%s6134_s5 + $0x2f8] sm:$0xff]  }
 0x35f   : > { %4294 = vmatpush3.bf16.msra.mxu0 %v4908_v15  ;;  %v5969_v15 = vmax.f32 %v5714_v14, %v2260_v5  ;;  %v4960_v14 = vld [vmem:[%s6134_s5 + $0x300] sm:$0xff]  }
 0x360   : > { %4295 = vmatprep.subr.bf16.mxu0 %v4909_v11  ;;  %v4958_v11 = vld [vmem:[%s6134_s5 + $0x2b8] sm:$0xff]  }
 0x361   : > { %v2285_v13 = vrot.slane %v5969_v15, 2  ;;  %v2303_v27 = vpack.c.bf16 %v5969_v15, %v5969_v15  ;;  %v2287_v49 = vrot.slane %v5969_v15, 4 }
 0x363   : > { %4296 = vmatpush3.bf16.msra.mxu0 %v4910_v36  ;;  %v2280_v36 = vrot.slane %v5864_v25, 4  ;;  %v2289_v25 = vrot.slane %v5969_v15, 6 }
 0x364   : > { %4303 = vmatprep.subr.bf16.mxu0 %v4911_v9  ;;  %v4959_v9 = vld [vmem:[%s6134_s5 + $0x340] sm:$0xff]  }
 0x365   : > { %v2306_v38 = vpack.c.bf16 %v2289_v25, %v2289_v25 }
 0x366   : > { %3445 = vmatmul.mubr.bf16.vlgmr.msra.gmra.mrb[40].mxu0 %v2295_v21  ;;  %v4961_v21 = vld [vmem:[%s6134_s5 + $0x348] sm:$0xff]  }
 0x367   : > { %4304 = vmatpush3.bf16.msra.mxu0 %v4912_v10  ;;  %3484 = vmatprep.mubr.bf16.mxu0 %v2298_v54  ;;  %v2301_v10 = vpack.c.bf16 %v2280_v36, %v2280_v36  ;;  %v4962_v54 = vld [vmem:[%s6134_s5 + $0x308] sm:$0xff]  }
 0x368   : > { %4305 = vmatprep.subr.bf16.mxu0 %v4913_v30  ;;  %v2304_v30 = vpack.c.bf16 %v2285_v13, %v2285_v13 }
 0x36b   : > { %4306 = vmatpush3.bf16.msra.mxu0 %v4914_v47  ;;  %v4963_v47 = vld [vmem:[%s6134_s5 + $0x350] sm:$0xff]  }
 0x36c   : > { %4307 = vmatprep.subr.bf16.mxu0 %v4915_v32  ;;  %v4964_v32 = vld [vmem:[%s6134_s5 + $0x310] sm:$0xff]  }
 0x36f   : > { %4308 = vmatpush3.bf16.msra.mxu0 %v4916_v37  ;;  %v4965_v37 = vld [vmem:[%s6134_s5 + $0x358] sm:$0xff]  }
 0x370   : > { %4309 = vmatprep.subr.bf16.mxu0 %v4917_v55  ;;  %v4966_v55 = vld [vmem:[%s6134_s5 + $0x318] sm:$0xff]  }
 0x373   : > { %4310 = vmatpush3.bf16.msra.mxu0 %v4918_v58  ;;  %v4967_v58 = vld [vmem:[%s6134_s5 + $0x360] sm:$0xff]  }
 0x374   : > { %4311 = vmatprep.subr.bf16.mxu0 %v4919_v60  ;;  %v4968_v60 = vld [vmem:[%s6134_s5 + $0x320] sm:$0xff]  }
 0x377   : > { %4312 = vmatpush3.bf16.msra.mxu0 %v4920_v61  ;;  %v4969_v61 = vld [vmem:[%s6134_s5 + $0x368] sm:$0xff]  }
 0x378   : > { %4313 = vmatprep.subr.bf16.mxu0 %v4921_v17  ;;  %v4970_v17 = vld [vmem:[%s6134_s5 + $0x328] sm:$0xff]  }
 0x37b   : > { %4314 = vmatpush3.bf16.msra.mxu0 %v4922_v19  ;;  %v4971_v19 = vld [vmem:[%s6134_s5 + $0x370] sm:$0xff]  }
 0x37c   : > { %4315 = vmatprep.subr.bf16.mxu0 %v4923_v20  ;;  %v4972_v20 = vld [vmem:[%s6134_s5 + $0x330] sm:$0xff]  }
 0x37f   : > { %4316 = vmatpush3.bf16.msra.mxu0 %v4924_v23  ;;  %v4974_v23 = vld [vmem:[%s6134_s5 + $0x338] sm:$0xff]  }
 0x380   : > { %4317 = vmatprep.subr.bf16.mxu0 %v4925_v24  ;;  %v4975_v24 = vld [vmem:[%s6134_s5 + $0x3c0] sm:$0xff]  }
 0x383   : > { %4318 = vmatpush3.bf16.msra.mxu0 %v4926_v26  ;;  %v4976_v26 = vld [vmem:[%s6134_s5 + $0x380] sm:$0xff]  }
 0x384   : > { %4325 = vmatprep.subr.bf16.mxu0 %v4927_v53  ;;  %v4977_v53 = vld [vmem:[%s6134_s5 + $0x3c8] sm:$0xff]  }
 0x386   : > { %3485 = vmatmul.mubr.bf16.vlgmr.msra.gmra.mrb[44].mxu0 %v2297_v63  ;;  %v4979_v63 = vld [vmem:[%s6134_s5 + $0x3d0] sm:$0xff]  }
 0x387   : > { %4326 = vmatpush3.bf16.msra.mxu0 %v4928_v52  ;;  %3524 = vmatprep.mubr.bf16.mxu0 %v2300_v2  ;;  %v4978_v52 = vld [vmem:[%s6134_s5 + $0x388] sm:$0xff]   ;;  %v4981_v2 = vld [vmem:[%s6134_s5 + $0x3d8] sm:$0xff]  }
 0x388   : > { %4327 = vmatprep.subr.bf16.mxu0 %v4929_v0  ;;  %v4980_v0 = vld [vmem:[%s6134_s5 + $0x390] sm:$0xff]  }
 0x38b   : > { %4328 = vmatpush3.bf16.msra.mxu0 %v4930_v12  ;;  %v4982_v12 = vld [vmem:[%s6134_s5 + $0x398] sm:$0xff]  }
 0x38c   : > { %4329 = vmatprep.subr.bf16.mxu0 %v4931_v28  ;;  %v4983_v28 = vld [vmem:[%s6134_s5 + $0x3e0] sm:$0xff]  }
 0x38f   : > { %4330 = vmatpush3.bf16.msra.mxu0 %v4932_v29  ;;  %v4984_v29 = vld [vmem:[%s6134_s5 + $0x3a0] sm:$0xff]  }
 0x390   : > { %4331 = vmatprep.subr.bf16.mxu0 %v4933_v16  ;;  %v4985_v16 = vld [vmem:[%s6134_s5 + $0x3e8] sm:$0xff]  }
 0x393   : > { %4332 = vmatpush3.bf16.msra.mxu0 %v4934_v39  ;;  %v4986_v39 = vld [vmem:[%s6134_s5 + $0x3a8] sm:$0xff]  }
 0x394   : > { %4333 = vmatprep.subr.bf16.mxu0 %v4935_v18  ;;  %v4987_v18 = vld [vmem:[%s6134_s5 + $0x3f0] sm:$0xff]  }
 0x397   : > { %4334 = vmatpush3.bf16.msra.mxu0 %v4936_v8 }
 0x398   : > { %4335 = vmatprep.subr.bf16.mxu0 %v4937_v40 }
 0x39b   : > { %4336 = vmatpush3.bf16.msra.mxu0 %v4938_v33 }
 0x39c   : > { %4337 = vmatprep.subr.bf16.mxu0 %v4939_v42 }
 0x39f   : > { %4338 = vmatpush3.bf16.msra.mxu0 %v4940_v43  ;;  %v4988_v43 = vld [vmem:[%s6134_s5 + $0x3b0] sm:$0xff]  }
 0x3a0   : > { %4339 = vmatprep.subr.bf16.mxu0 %v4941_v44 }
 0x3a3   : > { %4340 = vmatpush3.bf16.msra.mxu0 %v4942_v46  ;;  %v4989_v46 = vld [vmem:[%s6134_s5 + $0x3f8] sm:$0xff]  }
 0x3a4   : > { %4347 = vmatprep.subr.bf16.mxu0 %v4943_v48  ;;  %v4990_v48 = vld [vmem:[%s6134_s5 + $0x3b8] sm:$0xff]  }
 0x3a6   : > { %3525 = vmatmul.mubr.bf16.vlgmr.msra.gmra.mrb[48].mxu0 %v2299_v50  ;;  %v2563_v50 = vld [vmem:[%s6135_s6] sm:$0x1] }
 0x3a7   : > { %4348 = vmatpush3.bf16.msra.mxu0 %v4944_v45  ;;  %3564 = vmatprep.mubr.bf16.mxu0 %v2302_v31  ;;  %v2305_v45 = vpack.c.bf16 %v2287_v49, %v2287_v49 }
 0x3a8   : > { %4349 = vmatprep.subr.bf16.mxu0 %v4945_v56 }
 0x3ab   : > { %4350 = vmatpush3.bf16.msra.mxu0 %v4946_v51 }
 0x3ac   : > { %4351 = vmatprep.subr.bf16.mxu0 %v4947_v35 }
 0x3af   : > { %4352 = vmatpush3.bf16.msra.mxu0 %v4948_v57 }
 0x3b0   : > { %4353 = vmatprep.subr.bf16.mxu0 %v4949_v59 }
 0x3b3   : > { %4354 = vmatpush3.bf16.msra.mxu0 %v4950_v34 }
 0x3b4   : > { %4355 = vmatprep.subr.bf16.mxu0 %v4951_v41 }
 0x3b7   : > { %4356 = vmatpush3.bf16.msra.mxu0 %v4952_v62 }
 0x3b8   : > { %4357 = vmatprep.subr.bf16.mxu0 %v4953_v1 }
 0x3bb   : > { %4358 = vmatpush3.bf16.msra.mxu0 %v4954_v3 }
 0x3bc   : > { %4359 = vmatprep.subr.bf16.mxu0 %v4955_v4 }
 0x3bf   : > { %4360 = vmatpush3.bf16.msra.mxu0 %v4956_v6 }
 0x3c0   : > { %4361 = vmatprep.subr.bf16.mxu0 %v4957_v7 }
 0x3c3   : > { %4362 = vmatpush3.bf16.msra.mxu0 %v4958_v11 }
 0x3c4   : > { %4369 = vmatprep.subr.bf16.mxu0 %v4959_v9 }
 0x3c6   : > { %3565 = vmatmul.mubr.bf16.vlgmr.msra.gmra.mrb[52].mxu0 %v2301_v10 }
 0x3c7   : > { %4370 = vmatpush3.bf16.msra.mxu0 %v4960_v14  ;;  %3604 = vmatprep.mubr.bf16.mxu0 %v2304_v30 }
 0x3c8   : > { %4371 = vmatprep.subr.bf16.mxu0 %v4961_v21 }
 0x3cb   : > { %4372 = vmatpush3.bf16.msra.mxu0 %v4962_v54 }
 0x3cc   : > { %4373 = vmatprep.subr.bf16.mxu0 %v4963_v47 }
 0x3cf   : > { %4374 = vmatpush3.bf16.msra.mxu0 %v4964_v32 }
 0x3d0   : > { %4375 = vmatprep.subr.bf16.mxu0 %v4965_v37 }
 0x3d3   : > { %4376 = vmatpush3.bf16.msra.mxu0 %v4966_v55 }
 0x3d4   : > { %4377 = vmatprep.subr.bf16.mxu0 %v4967_v58 }
 0x3d7   : > { %4378 = vmatpush3.bf16.msra.mxu0 %v4968_v60 }
 0x3d8   : > { %4379 = vmatprep.subr.bf16.mxu0 %v4969_v61 }
 0x3db   : > { %4380 = vmatpush3.bf16.msra.mxu0 %v4970_v17 }
 0x3dc   : > { %4381 = vmatprep.subr.bf16.mxu0 %v4971_v19 }
 0x3df   : > { %4382 = vmatpush3.bf16.msra.mxu0 %v4972_v20 }
 0x3e0   : > { %4383 = vmatprep.subr.bf16.mxu0 %v4973_v22 }
 0x3e3   : > { %4384 = vmatpush3.bf16.msra.mxu0 %v4974_v23 }
 0x3e4   : > { %4391 = vmatprep.subr.bf16.mxu0 %v4975_v24 }
 0x3e6   : > { %3605 = vmatmul.mubr.bf16.vlgmr.msra.gmra.mrb[56].mxu0 %v2303_v27 }
 0x3e7   : > { %4392 = vmatpush3.bf16.msra.mxu0 %v4976_v26  ;;  %3644 = vmatprep.mubr.bf16.mxu0 %v2306_v38 }
 0x3e8   : > { %4393 = vmatprep.subr.bf16.mxu0 %v4977_v53 }
 0x3eb   : > { %4394 = vmatpush3.bf16.msra.mxu0 %v4978_v52 }
 0x3ec   : > { %4395 = vmatprep.subr.bf16.mxu0 %v4979_v63 }
 0x3ef   : > { %4396 = vmatpush3.bf16.msra.mxu0 %v4980_v0 }
 0x3f0   : > { %4397 = vmatprep.subr.bf16.mxu0 %v4981_v2 }
 0x3f3   : > { %4398 = vmatpush3.bf16.msra.mxu0 %v4982_v12 }
 0x3f4   : > { %4399 = vmatprep.subr.bf16.mxu0 %v4983_v28 }
 0x3f7   : > { %4400 = vmatpush3.bf16.msra.mxu0 %v4984_v29 }
 0x3f8   : > { %4401 = vmatprep.subr.bf16.mxu0 %v4985_v16 }
 0x3f9   : > { %v4253_v8 = vpop.f32.mrb[32].mxu0 }
 0x3fa   : > { %v4254_v40 = vpop.f32.mrb[33].mxu0 }
 0x3fb   : > { %v4255_v33 = vadd.f32 %v4254_v40, %v4253_v8  ;;  %4402 = vmatpush3.bf16.msra.mxu0 %v4986_v39  ;;  %v4256_v42 = vpop.f32.mrb[34].mxu0 }
 0x3fc   : > { %v4257_v44 = vpop.f32.mrb[35].mxu0  ;;  %4403 = vmatprep.subr.bf16.mxu0 %v4987_v18 }
 0x3fd   : > { %v3367_v51 = vadd.f32 %v4255_v33, %v2563_v50 }
 0x3ff   : > { %4404 = vmatpush3.bf16.msra.mxu0 %v4988_v43 }
 0x400   : > { %4405 = vmatprep.subr.bf16.mxu0 %v4989_v46 }
 0x403   : > { %4406 = vmatpush3.bf16.msra.mxu0 %v4990_v48 }
 0x406   : > { %3645 = vmatmul.mubr.bf16.vlgmr.msra.gmra.mrb[60].mxu0 %v2305_v45 }
 0x419   : > { %v4275_v56 = vpop.f32.mrb[36].mxu0 }
 0x41a   : > { %v4276_v31 = vpop.f32.mrb[37].mxu0 }
 0x41b   : > { %v4277_v35 = vadd.f32 %v4276_v31, %v4275_v56  ;;  %v4278_v57 = vpop.f32.mrb[38].mxu0 }
 0x41c   : > { %v4279_v59 = vpop.f32.mrb[39].mxu0 }
 0x41d   : > { %v3407_v34 = vadd.f32 %v4277_v35, %v3367_v51 }
 0x439   : > { %v4297_v41 = vpop.f32.mrb[40].mxu0 }
 0x43a   : > { %v4298_v62 = vpop.f32.mrb[41].mxu0 }
 0x43b   : > { %v4299_v1 = vadd.f32 %v4298_v62, %v4297_v41  ;;  %v4300_v3 = vpop.f32.mrb[42].mxu0 }
 0x43c   : > { %v4301_v4 = vpop.f32.mrb[43].mxu0 }
 0x43d   : > { %v3447_v5 = vadd.f32 %v4299_v1, %v3407_v34 }
 0x459   : > { %v4319_v6 = vpop.f32.mrb[44].mxu0 }
 0x45a   : > { %v4320_v7 = vpop.f32.mrb[45].mxu0 }
 0x45b   : > { %v4321_v15 = vadd.f32 %v4320_v7, %v4319_v6  ;;  %v4322_v11 = vpop.f32.mrb[46].mxu0 }
 0x45c   : > { %v4323_v36 = vpop.f32.mrb[47].mxu0 }
 0x45d   : > { %v3487_v9 = vadd.f32 %v4321_v15, %v3447_v5 }
 0x479   : > { %v4341_v13 = vpop.f32.mrb[48].mxu0 }
 0x47a   : > { %v4342_v14 = vpop.f32.mrb[49].mxu0 }
 0x47b   : > { %v4343_v10 = vadd.f32 %v4342_v14, %v4341_v13  ;;  %v4344_v21 = vpop.f32.mrb[50].mxu0 }
 0x47c   : > { %v4345_v30 = vpop.f32.mrb[51].mxu0 }
 0x47d   : > { %v3527_v54 = vadd.f32 %v4343_v10, %v3487_v9 }
 0x499   : > { %v4363_v47 = vpop.f32.mrb[52].mxu0 }
 0x49a   : > { %v4364_v32 = vpop.f32.mrb[53].mxu0 }
 0x49b   : > { %v4365_v37 = vadd.f32 %v4364_v32, %v4363_v47  ;;  %v4366_v55 = vpop.f32.mrb[54].mxu0 }
 0x49c   : > { %v4367_v58 = vpop.f32.mrb[55].mxu0 }
 0x49d   : > { %v3567_v60 = vadd.f32 %v4365_v37, %v3527_v54 }
 0x4b9   : > { %v4385_v61 = vpop.f32.mrb[56].mxu0 }
 0x4ba   : > { %v4386_v17 = vpop.f32.mrb[57].mxu0 }
 0x4bb   : > { %v4387_v19 = vadd.f32 %v4386_v17, %v4385_v61  ;;  %v4388_v20 = vpop.f32.mrb[58].mxu0 }
 0x4bc   : > { %v4389_v22 = vpop.f32.mrb[59].mxu0 }
 0x4bd   : > { %v3607_v23 = vadd.f32 %v4387_v19, %v3567_v60 }
 0x4d9   : > { %v4407_v24 = vpop.f32.mrb[60].mxu0 }
 0x4da   : > { %v4408_v25 = vpop.f32.mrb[61].mxu0 }
 0x4db   : > { %v4409_v26 = vadd.f32 %v4408_v25, %v4407_v24  ;;  %v4410_v27 = vpop.f32.mrb[62].mxu0 }
 0x4dc   : > { %v4411_v53 = vpop.f32.mrb[63].mxu0 }
 0x4dd   : > { %v3647_v38 = vadd.f32 %v4409_v26, %v3607_v23 }
 0x4df   : > { %v3652_v52 = vsub.f32 0.0, %v3647_v38 }
 0x4e1   : > { %v3653_v63 = vmul.f32 1.442695, %v3652_v52 }
 0x4e3   : > { %4991 = vpow2.f32 %v3653_v63 }
 0x4ed   : > { %v4992_v0 = vpop.eup %4991 }
 0x4ee   : > { %v3655_v2 = vadd.f32 1.0, %v4992_v0 }
 0x4f0   : > { %4993 = vrcp.f32 %v3655_v2 }
 0x4fa   : > { %v4994_v12 = vpop.eup %4993 }
 0x4fb   : > { %3658 = vst [vmem:[%s441_s19] sm:$0x1] %v4994_v12 }
 0x4fc   : > { %5008 = shalt.err (!%p5005_p5)
}
 0x4fd   : > { %s5009_s29 = scalar_lea.hbm %s6085_s23, 16  ;;  %s5013_s17 = scalar_lea.hbm %s6136_s7, 32 }
 0x4fe   : > { %p5010_p7 = scmp.ne.s32.totalorder %s6085_s23, %s5009_s29  ;;  %p5014_p12 = scmp.lt.u32.totalorder %s6085_s23, %s6136_s7 }
 0x4ff   : > { %p5015_p13 = scmp.lt.u32.totalorder %s5013_s17, %s5009_s29  ;;  %p5017_p1 = scmp.lt.u32.totalorder %s5009_s29, %s6085_s23 }
 0x500   : > { %p5011_p10 = pnand %p5010_p7, %p5139_p6 }
 0x501   : > { %p5016_p0 = por %p5015_p13, %p5014_p12 }
 0x502   : > { %p5012_p11 = pneg %p5011_p10 }
 0x503   : > { %p5018_p2 = por %p5017_p1, %p5016_p0 }
 0x505   : > { %p5019_p3 = pnand %p5018_p2, %p5012_p11 }
 0x507   : > { %5022 = shalt.err (!%p5019_p3)
}
 0x508   : > { %4732 = dma.vmem_to_hbm [thread:$0]  (%p5139_p6), %s6087_s20, 16, %s6085_s23, %s3660_s8  }
 0x509 PF: > { %s3684_s21 = sand.u32 1, %s5045_s24   ;;  %p4735_p4 = pnand %p3735_p9, %p5143_p8 }
 0x50a   : > { %s3685_s22 = scalar_lea.sflag [#allocation5], %s3684_s21 }
 0x50b   : > { %5040 = dma.done.wait (!%p4735_p4), %s3685_s22, 16  }
 0x50c   : > { %5042 = vsyncadd (!%p4735_p4), %s3685_s22, 4294967280  ;;  %p17_p5 = scmp.ge.s32.totalorder %s5124_s30, 4   ;;  %s6139_s24 = smov %s5049_s25 }
 0x50d   : > { %s6140_s25 = smov %s5053_s26  ;;  %s6141_s26 = smov %s5137_s10 }
 0x50e   : > { %s6142_s27 = smov %s5124_s30  ;;  %19 = sbr.rel (!%p17_p5) target bundleno = 3 (0x3), region = 140 }
 0x515   :  { %3689 = vsyncpa [#allocation5], 1 }
 0x516   :  { %3691 = vsyncpa [#allocation5 + $0x1], 1 }

</bundles_post_ra>
